<compile_context>
chip_gen: v6e
topology: v6e:2x2x1
jax: 0.10.0
libtpu: 0.0.40
codegen_flags: <defaults>
</compile_context>

<pallas_src>
import functools

import jax
import jax.numpy as jnp
from jax.experimental import pallas as pl
from jax.experimental.pallas import tpu as pltpu

IN_FEATURES = 28 * 28          # 784
HIDDEN = 200                   # logical hidden width (PyTorch cfg default)
OUT = 10                       # logical output width
HIDDEN_PAD = 256               # lane/MXU-friendly padding of 200
OUT_PAD = 128                  # lane-dense padding of 10
TILE_ALIGN = 256               # MXU M height (v6e/v7x); multiple of 16 for bf16 sublanes
VMEM_LIMIT_BYTES = 48 * 1024 * 1024   # > v5e's 16 MiB default scoped, < v7x's 64 MiB physical


def _round_up(x, m):
    return (x + m - 1) // m * m


def _spec(shape, index_map, *, buffers=None):
    """BlockSpec helper; falls back gracefully if pipeline_mode is unsupported."""
    if buffers is None:
        return pl.BlockSpec(shape, index_map)
    try:
        return pl.BlockSpec(shape, index_map, pipeline_mode=pl.Buffered(buffers))
    except TypeError:  # older jax without the pipeline_mode kwarg
        return pl.BlockSpec(shape, index_map)


def mlp_kernel(x_ref, w1_ref, b1_ref, w2_ref, b2_ref, w3_ref, b3_ref, o_ref):
    # x tile and weights arrive as bf16; all matmuls accumulate in f32 on the
    # MXU, bias-add/ReLU run in f32 on the VPU, final store is bf16.
    x = x_ref[...]                                            # (TILE_B, 784) bf16

    h1 = jnp.dot(x, w1_ref[...], preferred_element_type=jnp.float32) + b1_ref[...]
    h1 = jnp.maximum(h1, 0.0)                                 # relu1 (f32)

    h2 = jnp.dot(h1.astype(jnp.bfloat16), w2_ref[...],
                 preferred_element_type=jnp.float32) + b2_ref[...]
    h2 = jnp.maximum(h2, 0.0)                                 # relu2 (f32)

    out = jnp.dot(h2.astype(jnp.bfloat16), w3_ref[...],
                  preferred_element_type=jnp.float32) + b3_ref[...]
    o_ref[...] = out.astype(o_ref.dtype)                      # (TILE_B, 128) bf16


@functools.partial(jax.jit, static_argnames=("tile_b", "out_features", "trim"))
def mlp_forward(x_nchw, packed_params, *, tile_b=2048, out_features=OUT, trim=True):
    """x_nchw: (B, 1, 28, 28).

    trim=True  -> returns (B, out_features) float32 (module-equivalent output).
    trim=False -> returns the padded (b_pad, 128) bf16 kernel output directly so
                  a downstream consumer can fuse the batch/column slice.
    """
    B = x_nchw.shape[0]
    x = x_nchw.reshape(B, -1).astype(jnp.bfloat16)            # out = x.view(B, -1)

    w1, b1, w2, b2, w3, b3 = packed_params                    # padded, bf16 W / f32 b

    # --- Batch tiling ------------------------------------------------------
    # Tile is a multiple of 256; the grid always has an even number (>=2) of
    # tiles so the "parallel" axis can split across both v7x TensorCores.
    tb = _round_up(min(tile_b, B), TILE_ALIGN)
    n_tiles = max(2, pl.cdiv(B, tb))
    if n_tiles % 2:
        n_tiles += 1
    tb = _round_up(pl.cdiv(B, n_tiles), TILE_ALIGN)           # shrink tile, minimal padding
    b_pad = n_tiles * tb
    if b_pad != B:
        x = jnp.pad(x, ((0, b_pad - B), (0, 0)))

    tiled = lambda shape: _spec(shape, lambda i: (i, 0))                   # per-tile
    resident = lambda a: _spec(a.shape, lambda i: (0, 0), buffers=1)       # DMA'd once

    flops = 2 * b_pad * (IN_FEATURES * HIDDEN_PAD
                         + HIDDEN_PAD * HIDDEN_PAD
                         + HIDDEN_PAD * OUT_PAD)
    bytes_accessed = (x.size * 2
                      + sum(p.size * p.dtype.itemsize for p in packed_params)
                      + b_pad * OUT_PAD * 2)                  # bf16 writeback

    out_padded = pl.pallas_call(
        mlp_kernel,
        out_shape=jax.ShapeDtypeStruct((b_pad, OUT_PAD), jnp.bfloat16),
        grid=(n_tiles,),
        in_specs=[tiled((tb, IN_FEATURES)),
                  resident(w1), resident(b1),
                  resident(w2), resident(b2),
                  resident(w3), resident(b3)],
        out_specs=tiled((tb, OUT_PAD)),
        compiler_params=pltpu.CompilerParams(
            dimension_semantics=("parallel",),
            vmem_limit_bytes=VMEM_LIMIT_BYTES),
        cost_estimate=pl.CostEstimate(flops=flops, transcendentals=0,
                                      bytes_accessed=bytes_accessed),
    )(x, w1, b1, w2, b2, w3, b3)

    if not trim:
        return out_padded
    # Tiny (B, 10) slice; upcast to f32 to match nn.Linear output dtype.
    return out_padded[:B, :out_features].astype(jnp.float32)


def init_params(key, cfg=(HIDDEN, HIDDEN, OUT), in_features=IN_FEATURES):
    """Deterministic f32 init mimicking nn.Linear (uniform +/- 1/sqrt(fan_in)).
    MaskedLinear masks default to all-ones, so they are a no-op here."""
    dims = [in_features] + list(cfg)
    params = []
    for i in range(3):
        fan_in, fan_out = dims[i], dims[i + 1]
        key, kw, kb = jax.random.split(key, 3)
        bound = 1.0 / jnp.sqrt(fan_in)
        # PyTorch weight is (out, in); transpose to (in, out) for x @ W layout.
        w = jax.random.uniform(kw, (fan_out, fan_in), jnp.float32, -bound, bound).T
        b = jax.random.uniform(kb, (1, fan_out), jnp.float32, -bound, bound)
        params += [w, b]
    return params


def pack_params(params_f32):
    """Zero-pad feature dims to lane-friendly sizes and cast weights to bf16.

    Padded hidden units get zero weights + zero bias -> ReLU(0)=0, and the
    padded output columns are sliced off (or ignored) by the caller, so
    semantics match the unpadded f32 model up to bf16 rounding."""
    w1, b1, w2, b2, w3, b3 = params_f32

    def pad_w(w, rows, cols):
        return jnp.pad(w, ((0, rows - w.shape[0]),
                           (0, cols - w.shape[1]))).astype(jnp.bfloat16)

    def pad_b(b, cols):
        return jnp.pad(b, ((0, 0), (0, cols - b.shape[1]))).astype(jnp.float32)

    return (pad_w(w1, IN_FEATURES, HIDDEN_PAD), pad_b(b1, HIDDEN_PAD),
            pad_w(w2, HIDDEN_PAD, HIDDEN_PAD),  pad_b(b2, HIDDEN_PAD),
            pad_w(w3, HIDDEN_PAD, OUT_PAD),     pad_b(b3, OUT_PAD))


if __name__ == "__main__":
    key = jax.random.PRNGKey(0)
    key, kx = jax.random.split(key)

    B = 16
    x = jax.random.normal(kx, (B, 1, 28, 28), jnp.float32)    # NCHW, MNIST-like
    params = init_params(key)
    packed = pack_params(params)

    # Default (large-tile) path: B=16 gets padded to 2 tiles of 256 rows, so the
    # even-tile / parallel-axis path is exercised even at this tiny batch.
    out = mlp_forward(x, packed)
    out = jax.block_until_ready(out)
    assert out.shape == (B, OUT)
    assert out.dtype == jnp.float32

    # Reference 1: same bf16-input / f32-accumulate math in plain JAX
    # (extra tolerance for the bf16 output store).
    w1, b1, w2, b2, w3, b3 = params
    xf = x.reshape(B, -1)
    def bdot(a, w):
        return jnp.dot(a.astype(jnp.bfloat16), w.astype(jnp.bfloat16),
                       preferred_element_type=jnp.float32)
    ref_bf16 = jnp.maximum(bdot(xf, w1) + b1, 0.0)
    ref_bf16 = jnp.maximum(bdot(ref_bf16, w2) + b2, 0.0)
    ref_bf16 = bdot(ref_bf16, w3) + b3
    assert jnp.allclose(out, ref_bf16, atol=2e-2, rtol=2e-2)

    # Reference 2: full f32 model (loose tolerance for bf16 matmul inputs/output).
    ref_f32 = jnp.maximum(xf @ w1 + b1, 0.0)
    ref_f32 = jnp.maximum(ref_f32 @ w2 + b2, 0.0)
    ref_f32 = ref_f32 @ w3 + b3
    assert jnp.allclose(out, ref_f32, atol=1e-1, rtol=1e-1)

    print("KERNEL_OK")
</pallas_src>

<mosaic_0001>
module attributes {stable_mosaic.version = 11 : i64} {
  func.func @mlp_kernel(%arg0: i32, %arg1: memref<256x784xbf16, #tpu.memory_space<vmem>>, %arg2: memref<784x256xbf16, #tpu.memory_space<vmem>>, %arg3: memref<1x256xf32, #tpu.memory_space<vmem>>, %arg4: memref<256x256xbf16, #tpu.memory_space<vmem>>, %arg5: memref<1x256xf32, #tpu.memory_space<vmem>>, %arg6: memref<256x128xbf16, #tpu.memory_space<vmem>>, %arg7: memref<1x128xf32, #tpu.memory_space<vmem>>, %arg8: memref<256x128xbf16, #tpu.memory_space<vmem>>) attributes {dimension_semantics = [#tpu.dimension_semantics<parallel>], iteration_bounds = array<i64: 2>, scalar_prefetch = 0 : i64, scratch_operands = 0 : i64, tpu.core_type = #tpu.core_type<tc>, window_params = [{transform_indices = @transform_0, window_bounds = array<i64: 256, 784>}, {pipeline_mode = #tpu.pipeline_mode<synchronous>, transform_indices = @transform_1, window_bounds = array<i64: 784, 256>}, {pipeline_mode = #tpu.pipeline_mode<synchronous>, transform_indices = @transform_2, window_bounds = array<i64: 1, 256>}, {pipeline_mode = #tpu.pipeline_mode<synchronous>, transform_indices = @transform_3, window_bounds = array<i64: 256, 256>}, {pipeline_mode = #tpu.pipeline_mode<synchronous>, transform_indices = @transform_4, window_bounds = array<i64: 1, 256>}, {pipeline_mode = #tpu.pipeline_mode<synchronous>, transform_indices = @transform_5, window_bounds = array<i64: 256, 128>}, {pipeline_mode = #tpu.pipeline_mode<synchronous>, transform_indices = @transform_6, window_bounds = array<i64: 1, 128>}, {transform_indices = @transform_7, window_bounds = array<i64: 256, 128>}]} {
    %c0 = arith.constant 0 : index
    %c0_0 = arith.constant 0 : index
    %0 = vector.load %arg1[%c0, %c0_0] : memref<256x784xbf16, #tpu.memory_space<vmem>>, vector<256x784xbf16>
    %c0_1 = arith.constant 0 : index
    %c0_2 = arith.constant 0 : index
    %1 = vector.load %arg2[%c0_1, %c0_2] : memref<784x256xbf16, #tpu.memory_space<vmem>>, vector<784x256xbf16>
    %cst = arith.constant dense<0.000000e+00> : vector<256x256xf32>
    %2 = tpu.matmul %0, %1, %cst {dimension_numbers = #tpu.dot_dimension_numbers<[1], [0], [0], [1], [0, 0, 1, 1], [], []>} : vector<256x784xbf16>, vector<784x256xbf16>, vector<256x256xf32> -> vector<256x256xf32>
    %c0_3 = arith.constant 0 : index
    %c0_4 = arith.constant 0 : index
    %3 = vector.load %arg3[%c0_3, %c0_4] : memref<1x256xf32, #tpu.memory_space<vmem>>, vector<1x256xf32>
    %4 = vector.broadcast %3 : vector<1x256xf32> to vector<256x256xf32>
    %5 = arith.addf %2, %4 : vector<256x256xf32>
    %cst_5 = arith.constant 0.000000e+00 : f32
    %6 = vector.broadcast %cst_5 : f32 to vector<256x256xf32>
    %7 = arith.maximumf %5, %6 : vector<256x256xf32>
    %8 = arith.truncf %7 : vector<256x256xf32> to vector<256x256xbf16>
    %c0_6 = arith.constant 0 : index
    %c0_7 = arith.constant 0 : index
    %9 = vector.load %arg4[%c0_6, %c0_7] : memref<256x256xbf16, #tpu.memory_space<vmem>>, vector<256x256xbf16>
    %cst_8 = arith.constant dense<0.000000e+00> : vector<256x256xf32>
    %10 = tpu.matmul %8, %9, %cst_8 {dimension_numbers = #tpu.dot_dimension_numbers<[1], [0], [0], [1], [0, 0, 1, 1], [], []>} : vector<256x256xbf16>, vector<256x256xbf16>, vector<256x256xf32> -> vector<256x256xf32>
    %c0_9 = arith.constant 0 : index
    %c0_10 = arith.constant 0 : index
    %11 = vector.load %arg5[%c0_9, %c0_10] : memref<1x256xf32, #tpu.memory_space<vmem>>, vector<1x256xf32>
    %12 = vector.broadcast %11 : vector<1x256xf32> to vector<256x256xf32>
    %13 = arith.addf %10, %12 : vector<256x256xf32>
    %cst_11 = arith.constant 0.000000e+00 : f32
    %14 = vector.broadcast %cst_11 : f32 to vector<256x256xf32>
    %15 = arith.maximumf %13, %14 : vector<256x256xf32>
    %16 = arith.truncf %15 : vector<256x256xf32> to vector<256x256xbf16>
    %c0_12 = arith.constant 0 : index
    %c0_13 = arith.constant 0 : index
    %17 = vector.load %arg6[%c0_12, %c0_13] : memref<256x128xbf16, #tpu.memory_space<vmem>>, vector<256x128xbf16>
    %cst_14 = arith.constant dense<0.000000e+00> : vector<256x128xf32>
    %18 = tpu.matmul %16, %17, %cst_14 {dimension_numbers = #tpu.dot_dimension_numbers<[1], [0], [0], [1], [0, 0, 1, 1], [], []>} : vector<256x256xbf16>, vector<256x128xbf16>, vector<256x128xf32> -> vector<256x128xf32>
    %c0_15 = arith.constant 0 : index
    %c0_16 = arith.constant 0 : index
    %19 = vector.load %arg7[%c0_15, %c0_16] : memref<1x128xf32, #tpu.memory_space<vmem>>, vector<1x128xf32>
    %20 = vector.broadcast %19 : vector<1x128xf32> to vector<256x128xf32>
    %21 = arith.addf %18, %20 : vector<256x128xf32>
    %22 = arith.truncf %21 : vector<256x128xf32> to vector<256x128xbf16>
    %c0_17 = arith.constant 0 : index
    %c0_18 = arith.constant 0 : index
    %23 = vector.load %arg8[%c0_17, %c0_18] : memref<256x128xbf16, #tpu.memory_space<vmem>>, vector<256x128xbf16>
    tpu.vector_store %arg8[%c0_17, %c0_18], %22 {strides = array<i32>} : memref<256x128xbf16, #tpu.memory_space<vmem>>, vector<256x128xbf16>,
    return
  }
  func.func @transform_0(%arg0: i32) -> (i32, i32) {
    %c0_i32 = arith.constant 0 : i32
    %c0_i32_0 = arith.constant 0 : i32
    return %arg0, %c0_i32 : i32, i32
  }
  func.func @transform_1(%arg0: i32) -> (i32, i32) {
    %c0_i32 = arith.constant 0 : i32
    %c0_i32_0 = arith.constant 0 : i32
    %c0_i32_1 = arith.constant 0 : i32
    return %c0_i32, %c0_i32_0 : i32, i32
  }
  func.func @transform_2(%arg0: i32) -> (i32, i32) {
    %c0_i32 = arith.constant 0 : i32
    %c0_i32_0 = arith.constant 0 : i32
    %c0_i32_1 = arith.constant 0 : i32
    return %c0_i32, %c0_i32_0 : i32, i32
  }
  func.func @transform_3(%arg0: i32) -> (i32, i32) {
    %c0_i32 = arith.constant 0 : i32
    %c0_i32_0 = arith.constant 0 : i32
    %c0_i32_1 = arith.constant 0 : i32
    return %c0_i32, %c0_i32_0 : i32, i32
  }
  func.func @transform_4(%arg0: i32) -> (i32, i32) {
    %c0_i32 = arith.constant 0 : i32
    %c0_i32_0 = arith.constant 0 : i32
    %c0_i32_1 = arith.constant 0 : i32
    return %c0_i32, %c0_i32_0 : i32, i32
  }
  func.func @transform_5(%arg0: i32) -> (i32, i32) {
    %c0_i32 = arith.constant 0 : i32
    %c0_i32_0 = arith.constant 0 : i32
    %c0_i32_1 = arith.constant 0 : i32
    return %c0_i32, %c0_i32_0 : i32, i32
  }
  func.func @transform_6(%arg0: i32) -> (i32, i32) {
    %c0_i32 = arith.constant 0 : i32
    %c0_i32_0 = arith.constant 0 : i32
    %c0_i32_1 = arith.constant 0 : i32
    return %c0_i32, %c0_i32_0 : i32, i32
  }
  func.func @transform_7(%arg0: i32) -> (i32, i32) {
    %c0_i32 = arith.constant 0 : i32
    %c0_i32_0 = arith.constant 0 : i32
    return %arg0, %c0_i32 : i32, i32
  }
}

</mosaic_0001>

<bundles_post_ra>
// kernel: mlp_forward.1
= control target key start
LH: loop header
LB: loop body
LE: loop exit
PB: predicated region body
PF: predicated region fallthrough
CT: control target
= control target key end

     0   :  { %s4483_s24 = smov 0   ;;  %s5527_s0 = inlined_call_operand.vmem [shape: bf16[512,784], index: 0, kind: input, shape index: {}]   ;;  %s5528_s1 = inlined_call_operand.vmem [shape: bf16[784,256], index: 1, kind: input, shape index: {}]   ;;  %s5529_s2 = inlined_call_operand.vmem [shape: f32[1,256], index: 2, kind: input, shape index: {}]   ;;  %s5530_s3 = inlined_call_operand.vmem [shape: bf16[256,256], index: 3, kind: input, shape index: {}]   ;;  %s5531_s4 = inlined_call_operand.vmem [shape: f32[1,256], index: 4, kind: input, shape index: {}]   ;;  %s5532_s5 = inlined_call_operand.vmem [shape: bf16[256,128], index: 5, kind: input, shape index: {}]   ;;  %s5533_s6 = inlined_call_operand.vmem [shape: f32[1,128], index: 6, kind: input, shape index: {}]   ;;  %s5534_s7 = inlined_call_operand.vmem [shape: bf16[512,128], index: 7, kind: output, shape index: {}]  }
   0x1 LB: > { %s3496_s25 = sadd.s32 4294967295, %s4440_s24   ;;  %p3500_p0 = scmp.ge.s32.totalorder %s4440_s24, 1  ;;  %s4440_s24 = sphi %s4483_s24, %s17_s24  }
   0x2   : > { %p239_p1 = scmp.lt.s32.totalorder %s4440_s24, 3 }
   0x4   : > { %p240_p2 = pnand %p3500_p0, %p239_p1 }
   0x6   : > { %243 = sbr.rel (%p240_p2) target bundleno = 944 (0x3b0), region = 48 }
   0xb   : > { %v4063_v0 = vld [vmem:[%s5528_s1 + $0x74] ss:$8 sps:$4 sm:$0xff]   ;;  %v4067_v2 = vld [vmem:[%s5528_s1 + $0x70] ss:$8 sps:$4 sm:$0xff]   ;;  %v4069_v4 = vld [vmem:[%s5528_s1 + $0x64] ss:$8 sps:$4 sm:$0xff]  }
   0xc   : > { %v4065_v1 = vld [vmem:[%s5528_s1 + $0x174] ss:$8 sps:$4 sm:$0xff]   ;;  %1623 = vmatprep.subr.bf16.mxu0 %v4063_v0  ;;  %v4068_v3 = vld [vmem:[%s5528_s1 + $0x170] ss:$8 sps:$4 sm:$0xff]   ;;  %v4071_v5 = vld [vmem:[%s5528_s1 + $0x164] ss:$8 sps:$4 sm:$0xff]  }
   0xd   : > { %1816 = vmatprep.subr.bf16.mxu1 %v4065_v1  ;;  %1624 = vmatpush1.bf16.msra.mxu0 %v4067_v2  ;;  %v4073_v6 = vld [vmem:[%s5528_s1 + $0x60] ss:$8 sps:$4 sm:$0xff]   ;;  %v4075_v8 = vld [vmem:[%s5528_s1 + $0x54] ss:$8 sps:$4 sm:$0xff]   ;;  %v4079_v10 = vld [vmem:[%s5528_s1 + $0x50] ss:$8 sps:$4 sm:$0xff]  }
   0xe   : > { %1817 = vmatpush1.bf16.msra.mxu1 %v4068_v3  ;;  %1625 = vmatprep.subr.bf16.mxu0 %v4069_v4  ;;  %v4074_v7 = vld [vmem:[%s5528_s1 + $0x160] ss:$8 sps:$4 sm:$0xff]   ;;  %v4077_v9 = vld [vmem:[%s5528_s1 + $0x154] ss:$8 sps:$4 sm:$0xff]   ;;  %v4080_v11 = vld [vmem:[%s5528_s1 + $0x150] ss:$8 sps:$4 sm:$0xff]  }
   0xf   : > { %1818 = vmatprep.subr.bf16.mxu1 %v4071_v5  ;;  %v4081_v12 = vld [vmem:[%s5528_s1 + $0x44] ss:$8 sps:$4 sm:$0xff]   ;;  %v4085_v14 = vld [vmem:[%s5528_s1 + $0x40] ss:$8 sps:$4 sm:$0xff]   ;;  %v4087_v16 = vld [vmem:[%s5528_s1 + $0x34] ss:$8 sps:$4 sm:$0xff]  }
  0x10   : > { %v4083_v13 = vld [vmem:[%s5528_s1 + $0x144] ss:$8 sps:$4 sm:$0xff]   ;;  %v4086_v15 = vld [vmem:[%s5528_s1 + $0x140] ss:$8 sps:$4 sm:$0xff]   ;;  %v4089_v17 = vld [vmem:[%s5528_s1 + $0x134] ss:$8 sps:$4 sm:$0xff]  }
  0x11   : > { %1626 = vmatpush1.bf16.msra.mxu0 %v4073_v6  ;;  %v4091_v18 = vld [vmem:[%s5528_s1 + $0x30] ss:$8 sps:$4 sm:$0xff]   ;;  %v4093_v20 = vld [vmem:[%s5528_s1 + $0x24] ss:$8 sps:$4 sm:$0xff]   ;;  %v4097_v22 = vld [vmem:[%s5528_s1 + $0x20] ss:$8 sps:$4 sm:$0xff]  }
  0x12   : > { %1819 = vmatpush1.bf16.msra.mxu1 %v4074_v7  ;;  %1627 = vmatprep.subr.bf16.mxu0 %v4075_v8  ;;  %v4092_v19 = vld [vmem:[%s5528_s1 + $0x130] ss:$8 sps:$4 sm:$0xff]   ;;  %v4095_v21 = vld [vmem:[%s5528_s1 + $0x124] ss:$8 sps:$4 sm:$0xff]   ;;  %v4098_v23 = vld [vmem:[%s5528_s1 + $0x120] ss:$8 sps:$4 sm:$0xff]  }
  0x13   : > { %1820 = vmatprep.subr.bf16.mxu1 %v4077_v9  ;;  %v4099_v24 = vld [vmem:[%s5528_s1 + $0x14] ss:$8 sps:$4 sm:$0xff]   ;;  %v4103_v26 = vld [vmem:[%s5528_s1 + $0x10] ss:$8 sps:$4 sm:$0xff]   ;;  %v4105_v28 = vld [vmem:[%s5528_s1 + $0x4] ss:$8 sps:$4 sm:$0xff]  }
  0x14   : > { %v4101_v25 = vld [vmem:[%s5528_s1 + $0x114] ss:$8 sps:$4 sm:$0xff]   ;;  %v4104_v27 = vld [vmem:[%s5528_s1 + $0x110] ss:$8 sps:$4 sm:$0xff]   ;;  %v4107_v29 = vld [vmem:[%s5528_s1 + $0x104] ss:$8 sps:$4 sm:$0xff]  }
  0x15   : > { %1628 = vmatpush1.bf16.msra.mxu0 %v4079_v10  ;;  %s3501_s21 = sshll.u32 %s3496_s25, 5  ;;  %v4109_v30 = vld [vmem:[%s5528_s1] ss:$8 sps:$4 sm:$0xff]   ;;  %v4111_v32 = vld [vmem:[%s5528_s1 + $0xf4] ss:$8 sps:$4 sm:$0xff]   ;;  %vm1574_vm0 = vcmask 130048  }
  0x16   : > { %1821 = vmatpush1.bf16.msra.mxu1 %v4080_v11  ;;  %1629 = vmatprep.subr.bf16.mxu0 %v4081_v12  ;;  %v4110_v31 = vld [vmem:[%s5528_s1 + $0x100] ss:$8 sps:$4 sm:$0xff]   ;;  %p273_p3 = scmp.lt.s32.totalorder %s3501_s21, 63  ;;  %v4113_v33 = vld [vmem:[%s5528_s1 + $0x1f4] ss:$8 sps:$4 sm:$0xff]  }
  0x17   : > { %1822 = vmatprep.subr.bf16.mxu1 %v4083_v13  ;;  %v4115_v34 = vld [vmem:[%s5528_s1 + $0xf0] ss:$8 sps:$4 sm:$0xff]   ;;  %v4117_v36 = vld [vmem:[%s5528_s1 + $0xe4] ss:$8 sps:$4 sm:$0xff]   ;;  %v4121_v38 = vld [vmem:[%s5528_s1 + $0xe0] ss:$8 sps:$4 sm:$0xff]  }
  0x18   : > { %v4116_v35 = vld [vmem:[%s5528_s1 + $0x1f0] ss:$8 sps:$4 sm:$0xff]   ;;  %s5606_s21 = smov (!%p273_p3, %s3501_s21), 63  ;;  %v4119_v37 = vld [vmem:[%s5528_s1 + $0x1e4] ss:$8 sps:$4 sm:$0xff]  }
  0x19   : > { %1630 = vmatpush1.bf16.msra.mxu0 %v4085_v14  ;;  %v4122_v39 = vld [vmem:[%s5528_s1 + $0x1e0] ss:$8 sps:$4 sm:$0xff]   ;;  %v4123_v40 = vld [vmem:[%s5528_s1 + $0xd4] ss:$8 sps:$4 sm:$0xff]   ;;  %s4053_s23 = smul.u32 28, %s5606_s21  ;;  %s3504_s19 = sshll.u32 %s5606_s21, 2 }
  0x1a   : > { %1823 = vmatpush1.bf16.msra.mxu1 %v4086_v15  ;;  %1631 = vmatprep.subr.bf16.mxu0 %v4087_v16  ;;  %v4125_v41 = vld [vmem:[%s5528_s1 + $0x1d4] ss:$8 sps:$4 sm:$0xff]   ;;  %v4127_v42 = vld [vmem:[%s5528_s1 + $0xd0] ss:$8 sps:$4 sm:$0xff]   ;;  %v4129_v44 = vld [vmem:[%s5528_s1 + $0xc4] ss:$8 sps:$4 sm:$0xff]  }
  0x1b   : > { %1824 = vmatprep.subr.bf16.mxu1 %v4089_v17  ;;  %v4128_v43 = vld [vmem:[%s5528_s1 + $0x1d0] ss:$8 sps:$4 sm:$0xff]   ;;  %s4634_s12 = scalar_lea.vmem %s5527_s0, %s4053_s23  ;;  %v4131_v45 = vld [vmem:[%s5528_s1 + $0x1c4] ss:$8 sps:$4 sm:$0xff]   ;;  %v4133_v46 = vld [vmem:[%s5528_s1 + $0xc0] ss:$8 sps:$4 sm:$0xff]   ;;  %s5476_s23 = scalar_lea.vmem %s5534_s7, %s3504_s19 }
  0x1c   : > { %v4134_v47 = vld [vmem:[%s5528_s1 + $0x1c0] ss:$8 sps:$4 sm:$0xff]   ;;  %v4135_v48 = vld [vmem:[%s5528_s1 + $0xb4] ss:$8 sps:$4 sm:$0xff]   ;;  %v4139_v52 = vld [vmem:[%s5528_s1 + $0xb0] ss:$8 sps:$4 sm:$0xff]  }
  0x1d   : > { %1632 = vmatpush1.bf16.msra.mxu0 %v4091_v18  ;;  %v4161_v49 = vld [vmem:[%s4634_s12 + $0x4] ss:$28 sps:$4 sm:$0xff]   ;;  %v4137_v50 = vld [vmem:[%s5528_s1 + $0x1b4] ss:$8 sps:$4 sm:$0xff]   ;;  %v4164_v51 = vld [vmem:[%s4634_s12 + $0xc] ss:$28 sps:$4 sm:$0xff]  }
  0x1e   : > { %1825 = vmatpush1.bf16.msra.mxu1 %v4092_v19  ;;  %1633 = vmatprep.subr.bf16.mxu0 %v4093_v20  ;;  %v4140_v53 = vld [vmem:[%s5528_s1 + $0x1b0] ss:$8 sps:$4 sm:$0xff]   ;;  %v4141_v54 = vld [vmem:[%s5528_s1 + $0xa4] ss:$8 sps:$4 sm:$0xff]   ;;  %v4145_v56 = vld [vmem:[%s5528_s1 + $0xa0] ss:$8 sps:$4 sm:$0xff]  }
  0x1f   : > { %1826 = vmatprep.subr.bf16.mxu1 %v4095_v21  ;;  %1655 = vmatprep.mubr.bf16.mxu0 %v4161_v49  ;;  %v4143_v55 = vld [vmem:[%s5528_s1 + $0x1a4] ss:$8 sps:$4 sm:$0xff]   ;;  %v4146_v57 = vld [vmem:[%s5528_s1 + $0x1a0] ss:$8 sps:$4 sm:$0xff]   ;;  %v4147_v58 = vld [vmem:[%s5528_s1 + $0x94] ss:$8 sps:$4 sm:$0xff]  }
  0x20   : > { %1848 = vmatprep.mubr.bf16.mxu1 %v4164_v51  ;;  %v4149_v59 = vld [vmem:[%s5528_s1 + $0x194] ss:$8 sps:$4 sm:$0xff]   ;;  %v4151_v60 = vld [vmem:[%s5528_s1 + $0x90] ss:$8 sps:$4 sm:$0xff]   ;;  %v4153_v62 = vld [vmem:[%s5528_s1 + $0x84] ss:$8 sps:$4 sm:$0xff]  }
  0x21   : > { %1634 = vmatpush1.bf16.msra.mxu0 %v4097_v22  ;;  %v4152_v61 = vld [vmem:[%s5528_s1 + $0x190] ss:$8 sps:$4 sm:$0xff]   ;;  %v4155_v63 = vld [vmem:[%s5528_s1 + $0x184] ss:$8 sps:$4 sm:$0xff]   ;;  %v4157_v0 = vld [vmem:[%s5528_s1 + $0x80] ss:$8 sps:$4 sm:$0xff]  }
  0x22   : > { %1827 = vmatpush1.bf16.msra.mxu1 %v4098_v23  ;;  %1635 = vmatprep.subr.bf16.mxu0 %v4099_v24  ;;  %v4158_v1 = vld [vmem:[%s5528_s1 + $0x180] ss:$8 sps:$4 sm:$0xff]   ;;  %v4167_v2 = vld [vmem:[%s5528_s1 + $0x274] ss:$8 sps:$4 sm:$0xff]   ;;  %v4170_v3 = vld [vmem:[%s5528_s1 + $0x304] ss:$8 sps:$4 sm:$0xff]  }
  0x23   : > { %1828 = vmatprep.subr.bf16.mxu1 %v4101_v25  ;;  %v4159_v4 = vld [vmem:[%s4634_s12] ss:$28 sps:$4 sm:$0xff]   ;;  %v4162_v5 = vld [vmem:[%s4634_s12 + $0x8] ss:$28 sps:$4 sm:$0xff]   ;;  %v4165_v6 = vld [vmem:[%s5528_s1 + $0x270] ss:$8 sps:$4 sm:$0xff]  }
  0x24   : > { %v4168_v7 = vld [vmem:[%s5528_s1 + $0x300] ss:$8 sps:$4 sm:$0xff]   ;;  %v4171_v8 = vld [vmem:[%s4634_s12 + $0x3c] ss:$28 sps:$4 sm:$0xff]   ;;  %v4179_v10 = vld [vmem:[%s5528_s1 + $0x264] ss:$8 sps:$4 sm:$0xff]  }
  0x25   : > { %1636 = vmatpush1.bf16.msra.mxu0 %v4103_v26  ;;  %v4173_v9 = vld [vmem:[%s4634_s12 + $0x44] ss:$28 sps:$4 sm:$0xff]   ;;  %v4188_v12 = vld [vmem:[%s5528_s1 + $0x254] ss:$8 sps:$4 sm:$0xff]   ;;  %v4186_v17 = vld [vmem:[%s5528_s1 + $0x250] ss:$8 sps:$4 sm:$0xff]  }
  0x26   : > { %1829 = vmatpush1.bf16.msra.mxu1 %v4104_v27  ;;  %1637 = vmatprep.subr.bf16.mxu0 %v4105_v28  ;;  %v4177_v11 = vld [vmem:[%s5528_s1 + $0x260] ss:$8 sps:$4 sm:$0xff]   ;;  %v4175_v13 = vld [vmem:[%s4634_s12 + $0x38] ss:$28 sps:$4 sm:$0xff]   ;;  %v4197_v18 = vld [vmem:[%s5528_s1 + $0x244] ss:$8 sps:$4 sm:$0xff]  }
  0x27   : > { %1830 = vmatprep.subr.bf16.mxu1 %v4107_v29  ;;  %v4176_v14 = vld [vmem:[%s4634_s12 + $0x40] ss:$28 sps:$4 sm:$0xff]   ;;  %v4180_v15 = vld [vmem:[%s4634_s12 + $0x74] ss:$28 sps:$4 sm:$0xff]   ;;  %v4189_v23 = vld [vmem:[%s4634_s12 + $0xac] ss:$28 sps:$4 sm:$0xff]  }
  0x28   : > { %v4182_v16 = vld [vmem:[%s4634_s12 + $0x7c] ss:$28 sps:$4 sm:$0xff]   ;;  %v4195_v19 = vld [vmem:[%s5528_s1 + $0x240] ss:$8 sps:$4 sm:$0xff]   ;;  %v4184_v20 = vld [vmem:[%s4634_s12 + $0x70] ss:$28 sps:$4 sm:$0xff]  }
  0x29   : > { %1638 = vmatpush1.bf16.msra.mxu0 %v4109_v30  ;;  %v4206_v21 = vld [vmem:[%s5528_s1 + $0x234] ss:$8 sps:$4 sm:$0xff]   ;;  %v4204_v25 = vld [vmem:[%s5528_s1 + $0x230] ss:$8 sps:$4 sm:$0xff]   ;;  %v4215_v26 = vld [vmem:[%s5528_s1 + $0x224] ss:$8 sps:$4 sm:$0xff]  }
  0x2a   : > { %1831 = vmatpush1.bf16.msra.mxu1 %v4110_v31  ;;  %1639 = vmatprep.subr.bf16.mxu0 %v4111_v32  ;;  %v4185_v22 = vld [vmem:[%s4634_s12 + $0x78] ss:$28 sps:$4 sm:$0xff]   ;;  %v4213_v27 = vld [vmem:[%s5528_s1 + $0x220] ss:$8 sps:$4 sm:$0xff]   ;;  %v4194_v30 = vld [vmem:[%s4634_s12 + $0xb0] ss:$28 sps:$4 sm:$0xff]  }
  0x2b   : > { %1832 = vmatprep.subr.bf16.mxu1 %v4113_v33  ;;  %v4191_v24 = vld [vmem:[%s4634_s12 + $0xb4] ss:$28 sps:$4 sm:$0xff]   ;;  %v4193_v28 = vld [vmem:[%s4634_s12 + $0xa8] ss:$28 sps:$4 sm:$0xff]  }
  0x2c   : > { %v4224_v29 = vld [vmem:[%s5528_s1 + $0x214] ss:$8 sps:$4 sm:$0xff]   ;;  %v4198_v31 = vld [vmem:[%s4634_s12 + $0xe4] ss:$28 sps:$4 sm:$0xff]   ;;  %v4200_v32 = vld [vmem:[%s4634_s12 + $0xec] ss:$28 sps:$4 sm:$0xff]  }
  0x2d   : > { %1640 = vmatpush2.bf16.msra.mxu0 %v4115_v34  ;;  %v4222_v33 = vld [vmem:[%s5528_s1 + $0x210] ss:$8 sps:$4 sm:$0xff]   ;;  %v4233_v34 = vld [vmem:[%s5528_s1 + $0x204] ss:$8 sps:$4 sm:$0xff]  }
  0x2e   : > { %1833 = vmatpush2.bf16.msra.mxu1 %v4116_v35  ;;  %1641 = vmatprep.subr.bf16.mxu0 %v4117_v36  ;;  %v4231_v35 = vld [vmem:[%s5528_s1 + $0x200] ss:$8 sps:$4 sm:$0xff]   ;;  %v4258_v49 = vld [vmem:[%s5528_s1 + $0x2d0] ss:$8 sps:$4 sm:$0xff]  }
  0x2f   : > { %1834 = vmatprep.subr.bf16.mxu1 %v4119_v37  ;;  %v4202_v36 = vld [vmem:[%s4634_s12 + $0xe0] ss:$28 sps:$4 sm:$0xff]   ;;  %v4220_v51 = vld [vmem:[%s4634_s12 + $0x150] ss:$28 sps:$4 sm:$0xff]  }
  0x30   : > { %v4242_v37 = vld [vmem:[%s5528_s1 + $0x2f4] ss:$8 sps:$4 sm:$0xff]  }
  0x31   : > { %1642 = vmatpush2.bf16.msra.mxu0 %v4121_v38  ;;  %v4203_v38 = vld [vmem:[%s4634_s12 + $0xe8] ss:$28 sps:$4 sm:$0xff]  }
  0x32   : > { %1835 = vmatpush2.bf16.msra.mxu1 %v4122_v39  ;;  %1643 = vmatprep.subr.bf16.mxu0 %v4123_v40  ;;  %v4207_v39 = vld [vmem:[%s4634_s12 + $0x11c] ss:$28 sps:$4 sm:$0xff]   ;;  %v4209_v40 = vld [vmem:[%s4634_s12 + $0x124] ss:$28 sps:$4 sm:$0xff]  }
  0x33   : > { %1836 = vmatprep.subr.bf16.mxu1 %v4125_v41  ;;  %v4240_v41 = vld [vmem:[%s5528_s1 + $0x2f0] ss:$8 sps:$4 sm:$0xff]  }
  0x35   : > { %1644 = vmatpush2.bf16.msra.mxu0 %v4127_v42  ;;  %v4251_v42 = vld [vmem:[%s5528_s1 + $0x2e4] ss:$8 sps:$4 sm:$0xff]  }
  0x36   : > { %1837 = vmatpush2.bf16.msra.mxu1 %v4128_v43  ;;  %1645 = vmatprep.subr.bf16.mxu0 %v4129_v44  ;;  %v4249_v43 = vld [vmem:[%s5528_s1 + $0x2e0] ss:$8 sps:$4 sm:$0xff]   ;;  %v4211_v44 = vld [vmem:[%s4634_s12 + $0x118] ss:$28 sps:$4 sm:$0xff]  }
  0x37   : > { %1838 = vmatprep.subr.bf16.mxu1 %v4131_v45  ;;  %v4260_v45 = vld [vmem:[%s5528_s1 + $0x2d4] ss:$8 sps:$4 sm:$0xff]  }
  0x39   : > { %1646 = vmatpush2.bf16.msra.mxu0 %v4133_v46  ;;  %v4212_v46 = vld [vmem:[%s4634_s12 + $0x120] ss:$28 sps:$4 sm:$0xff]  }
  0x3a   : > { %1839 = vmatpush2.bf16.msra.mxu1 %v4134_v47  ;;  %1647 = vmatprep.subr.bf16.mxu0 %v4135_v48  ;;  %v4216_v47 = vld [vmem:[%s4634_s12 + $0x154] ss:$28 sps:$4 sm:$0xff]   ;;  %v4218_v48 = vld [vmem:[%s4634_s12 + $0x15c] ss:$28 sps:$4 sm:$0xff]  }
  0x3b   : > { %1840 = vmatprep.subr.bf16.mxu1 %v4137_v50  ;;  %v4269_v50 = vld [vmem:[%s5528_s1 + $0x2c4] ss:$8 sps:$4 sm:$0xff]  }
  0x3d   : > { %1648 = vmatpush2.bf16.msra.mxu0 %v4139_v52  ;;  %v4267_v52 = vld [vmem:[%s5528_s1 + $0x2c0] ss:$8 sps:$4 sm:$0xff]  }
  0x3e   : > { %1841 = vmatpush2.bf16.msra.mxu1 %v4140_v53  ;;  %1649 = vmatprep.subr.bf16.mxu0 %v4141_v54  ;;  %v4278_v53 = vld [vmem:[%s5528_s1 + $0x2b4] ss:$8 sps:$4 sm:$0xff]  }
  0x3f   : > { %1842 = vmatprep.subr.bf16.mxu1 %v4143_v55  ;;  %v4221_v54 = vld [vmem:[%s4634_s12 + $0x158] ss:$28 sps:$4 sm:$0xff]   ;;  %v4225_v55 = vld [vmem:[%s4634_s12 + $0x18c] ss:$28 sps:$4 sm:$0xff]  }
  0x41   : > { %1650 = vmatpush2.bf16.msra.mxu0 %v4145_v56  ;;  %v4227_v56 = vld [vmem:[%s4634_s12 + $0x194] ss:$28 sps:$4 sm:$0xff]  }
  0x42   : > { %1843 = vmatpush2.bf16.msra.mxu1 %v4146_v57  ;;  %1651 = vmatprep.subr.bf16.mxu0 %v4147_v58  ;;  %v4276_v57 = vld [vmem:[%s5528_s1 + $0x2b0] ss:$8 sps:$4 sm:$0xff]   ;;  %v4287_v58 = vld [vmem:[%s5528_s1 + $0x2a4] ss:$8 sps:$4 sm:$0xff]  }
  0x43   : > { %1844 = vmatprep.subr.bf16.mxu1 %v4149_v59  ;;  %v4285_v59 = vld [vmem:[%s5528_s1 + $0x2a0] ss:$8 sps:$4 sm:$0xff]  }
  0x45   : > { %1652 = vmatpush2.bf16.msra.mxu0 %v4151_v60  ;;  %v4229_v60 = vld [vmem:[%s4634_s12 + $0x188] ss:$28 sps:$4 sm:$0xff]  }
  0x46   : > { %1845 = vmatpush2.bf16.msra.mxu1 %v4152_v61  ;;  %1653 = vmatprep.subr.bf16.mxu0 %v4153_v62  ;;  %v4296_v61 = vld [vmem:[%s5528_s1 + $0x294] ss:$8 sps:$4 sm:$0xff]   ;;  %v4230_v62 = vld [vmem:[%s4634_s12 + $0x190] ss:$28 sps:$4 sm:$0xff]  }
  0x47   : > { %1846 = vmatprep.subr.bf16.mxu1 %v4155_v63  ;;  %v4234_v63 = vld [vmem:[%s4634_s12 + $0x1c4] ss:$28 sps:$4 sm:$0xff]  }
  0x49   : > { %1654 = vmatpush2.bf16.msra.mxu0 %v4157_v0  ;;  %v4236_v0 = vld [vmem:[%s4634_s12 + $0x1cc] ss:$28 sps:$4 sm:$0xff]  }
  0x4a   : > { %1847 = vmatpush2.bf16.msra.mxu1 %v4158_v1  ;;  %2009 = vmatprep.subr.bf16.mxu0 %v4167_v2  ;;  %v4294_v1 = vld [vmem:[%s5528_s1 + $0x290] ss:$8 sps:$4 sm:$0xff]   ;;  %v4305_v2 = vld [vmem:[%s5528_s1 + $0x284] ss:$8 sps:$4 sm:$0xff]  }
  0x4b   : > { %2216 = vmatprep.subr.bf16.mxu1 %v4170_v3  ;;  %v4238_v3 = vld [vmem:[%s4634_s12 + $0x1c0] ss:$28 sps:$4 sm:$0xff]  }
  0x4c   : > { %1656 = vmatmul.mubr.bf16.vlgmr.msra.gmra.mxu0 %v4159_v4  ;;  %v4303_v4 = vld [vmem:[%s5528_s1 + $0x280] ss:$8 sps:$4 sm:$0xff]  }
  0x4d   : > { %1849 = vmatmul.mubr.bf16.vlgmr.msra.gmra.mxu1 %v4162_v5  ;;  %2010 = vmatpush1.bf16.msra.mxu0 %v4165_v6  ;;  %v4239_v5 = vld [vmem:[%s4634_s12 + $0x1c8] ss:$28 sps:$4 sm:$0xff]   ;;  %v4243_v6 = vld [vmem:[%s4634_s12 + $0x1fc] ss:$28 sps:$4 sm:$0xff]  }
  0x4e   : > { %2217 = vmatpush1.bf16.msra.mxu1 %v4168_v7  ;;  %1665 = vmatprep.mubr.bf16.mxu0 %v4171_v8  ;;  %v4245_v7 = vld [vmem:[%s4634_s12 + $0x204] ss:$28 sps:$4 sm:$0xff]   ;;  %v4247_v8 = vld [vmem:[%s4634_s12 + $0x1f8] ss:$28 sps:$4 sm:$0xff]  }
  0x4f   : > { %1858 = vmatprep.mubr.bf16.mxu1 %v4173_v9  ;;  %2011 = vmatprep.subr.bf16.mxu0 %v4179_v10  ;;  %v4248_v9 = vld [vmem:[%s4634_s12 + $0x200] ss:$28 sps:$4 sm:$0xff]   ;;  %v4252_v10 = vld [vmem:[%s4634_s12 + $0x234] ss:$28 sps:$4 sm:$0xff]  }
  0x51   : > { %2012 = vmatpush1.bf16.msra.mxu0 %v4177_v11  ;;  %v4254_v11 = vld [vmem:[%s4634_s12 + $0x23c] ss:$28 sps:$4 sm:$0xff]  }
  0x52   : > { %2013 = vmatprep.subr.bf16.mxu0 %v4188_v12  ;;  %v4256_v12 = vld [vmem:[%s4634_s12 + $0x230] ss:$28 sps:$4 sm:$0xff]  }
  0x54   : > { %1666 = vmatmul.mubr.bf16.gmra.mxu0 %v4175_v13  ;;  %v4257_v13 = vld [vmem:[%s4634_s12 + $0x238] ss:$28 sps:$4 sm:$0xff]  }
  0x55   : > { %1859 = vmatmul.mubr.bf16.gmra.mxu1 %v4176_v14  ;;  %1675 = vmatprep.mubr.bf16.mxu0 %v4180_v15  ;;  %v4261_v14 = vld [vmem:[%s4634_s12 + $0x26c] ss:$28 sps:$4 sm:$0xff]   ;;  %v4263_v15 = vld [vmem:[%s4634_s12 + $0x274] ss:$28 sps:$4 sm:$0xff]  }
  0x56   : > { %1868 = vmatprep.mubr.bf16.mxu1 %v4182_v16  ;;  %2014 = vmatpush1.bf16.msra.mxu0 %v4186_v17  ;;  %v4265_v16 = vld [vmem:[%s4634_s12 + $0x268] ss:$28 sps:$4 sm:$0xff]   ;;  %v4266_v17 = vld [vmem:[%s4634_s12 + $0x270] ss:$28 sps:$4 sm:$0xff]  }
  0x57   : > { %2015 = vmatprep.subr.bf16.mxu0 %v4197_v18  ;;  %v4270_v18 = vld [vmem:[%s4634_s12 + $0x2a4] ss:$28 sps:$4 sm:$0xff]  }
  0x5a   : > { %2016 = vmatpush1.bf16.msra.mxu0 %v4195_v19  ;;  %v4352_v19 = vld [vmem:[%s5530_s3 + $0x74] ss:$8 sps:$4 sm:$0xff]  }
  0x5b   : > { %2017 = vmatprep.subr.bf16.mxu0 %v4206_v21  ;;  %v4274_v21 = vld [vmem:[%s4634_s12 + $0x2a0] ss:$28 sps:$4 sm:$0xff]  }
  0x5c   : > { %1676 = vmatmul.mubr.bf16.gmra.mxu0 %v4184_v20  ;;  %v4272_v20 = vld [vmem:[%s4634_s12 + $0x2ac] ss:$28 sps:$4 sm:$0xff]  }
  0x5d   : > { %1869 = vmatmul.mubr.bf16.gmra.mxu1 %v4185_v22  ;;  %1685 = vmatprep.mubr.bf16.mxu0 %v4189_v23  ;;  %v4275_v22 = vld [vmem:[%s4634_s12 + $0x2a8] ss:$28 sps:$4 sm:$0xff]   ;;  %v4279_v23 = vld [vmem:[%s4634_s12 + $0x2dc] ss:$28 sps:$4 sm:$0xff]  }
  0x5e   : > { %1878 = vmatprep.mubr.bf16.mxu1 %v4191_v24  ;;  %2018 = vmatpush1.bf16.msra.mxu0 %v4204_v25  ;;  %v4281_v24 = vld [vmem:[%s4634_s12 + $0x2e4] ss:$28 sps:$4 sm:$0xff]   ;;  %v4283_v25 = vld [vmem:[%s4634_s12 + $0x2d8] ss:$28 sps:$4 sm:$0xff]  }
  0x5f   : > { %2019 = vmatprep.subr.bf16.mxu0 %v4215_v26  ;;  %v4284_v26 = vld [vmem:[%s4634_s12 + $0x2e0] ss:$28 sps:$4 sm:$0xff]  }
  0x62   : > { %2020 = vmatpush1.bf16.msra.mxu0 %v4213_v27  ;;  %v4288_v27 = vld [vmem:[%s4634_s12 + $0x314] ss:$28 sps:$4 sm:$0xff]  }
  0x63   : > { %2021 = vmatprep.subr.bf16.mxu0 %v4224_v29  ;;  %v4292_v29 = vld [vmem:[%s4634_s12 + $0x310] ss:$28 sps:$4 sm:$0xff]  }
  0x64   : > { %1686 = vmatmul.mubr.bf16.gmra.mxu0 %v4193_v28  ;;  %v4290_v28 = vld [vmem:[%s4634_s12 + $0x31c] ss:$28 sps:$4 sm:$0xff]  }
  0x65   : > { %1879 = vmatmul.mubr.bf16.gmra.mxu1 %v4194_v30  ;;  %1695 = vmatprep.mubr.bf16.mxu0 %v4198_v31  ;;  %v4293_v30 = vld [vmem:[%s4634_s12 + $0x318] ss:$28 sps:$4 sm:$0xff]   ;;  %v4297_v31 = vld [vmem:[%s4634_s12 + $0x34c] ss:$28 sps:$4 sm:$0xff]  }
  0x66   : > { %1888 = vmatprep.mubr.bf16.mxu1 %v4200_v32  ;;  %2022 = vmatpush1.bf16.msra.mxu0 %v4222_v33  ;;  %v4299_v32 = vld [vmem:[%s4634_s12 + $0x354] ss:$28 sps:$4 sm:$0xff]   ;;  %v4301_v33 = vld [vmem:[%s4634_s12 + $0x348] ss:$28 sps:$4 sm:$0xff]  }
  0x67   : > { %2023 = vmatprep.subr.bf16.mxu0 %v4233_v34  ;;  %v4302_v34 = vld [vmem:[%s4634_s12 + $0x350] ss:$28 sps:$4 sm:$0xff]  }
  0x6a   : > { %2024 = vmatpush1.bf16.msra.mxu0 %v4231_v35  ;;  %v4308_v35 = vld [vmem:[%s4634_s12 + $0x14] ss:$28 sps:$4 sm:$0xff]  }
  0x6b   : > { %2025 = vmatprep.subr.bf16.mxu0 %v4242_v37  ;;  %v4306_v37 = vld [vmem:[%s4634_s12 + $0x10] ss:$28 sps:$4 sm:$0xff]  }
  0x6c   : > { %1696 = vmatmul.mubr.bf16.gmra.mxu0 %v4202_v36  ;;  %v4442_v36 = vmov 0  }
  0x6d   : > { %1889 = vmatmul.mubr.bf16.gmra.mxu1 %v4203_v38  ;;  %1705 = vmatprep.mubr.bf16.mxu0 %v4207_v39  ;;  %v4309_v38 = vld [vmem:[%s4634_s12 + $0x18] ss:$28 sps:$4 sm:$0xff]   ;;  %v4310_v39 = vld [vmem:[%s4634_s12 + $0x4c] ss:$28 sps:$4 sm:$0xff]  }
  0x6e   : > { %1898 = vmatprep.mubr.bf16.mxu1 %v4209_v40  ;;  %2026 = vmatpush2.bf16.msra.mxu0 %v4240_v41  ;;  %v4350_v40 = vld [vmem:[%s5530_s3 + $0x70] ss:$8 sps:$4 sm:$0xff]   ;;  %v4359_v41 = vld [vmem:[%s5530_s3 + $0x64] ss:$8 sps:$4 sm:$0xff]  }
  0x6f   : > { %2027 = vmatprep.subr.bf16.mxu0 %v4251_v42  ;;  %v4357_v42 = vld [vmem:[%s5530_s3 + $0x60] ss:$8 sps:$4 sm:$0xff]  }
  0x72   : > { %2028 = vmatpush2.bf16.msra.mxu0 %v4249_v43  ;;  %v4366_v43 = vld [vmem:[%s5530_s3 + $0x54] ss:$8 sps:$4 sm:$0xff]  }
  0x73   : > { %2029 = vmatprep.subr.bf16.mxu0 %v4260_v45  ;;  %v4313_v45 = vld [vmem:[%s4634_s12 + $0x50] ss:$28 sps:$4 sm:$0xff]  }
  0x74   : > { %1706 = vmatmul.mubr.bf16.gmra.mxu0 %v4211_v44  ;;  %v4312_v44 = vld [vmem:[%s4634_s12 + $0x48] ss:$28 sps:$4 sm:$0xff]  }
  0x75   : > { %1899 = vmatmul.mubr.bf16.gmra.mxu1 %v4212_v46  ;;  %1715 = vmatprep.mubr.bf16.mxu0 %v4216_v47  ;;  %v4314_v46 = vld [vmem:[%s4634_s12 + $0x84] ss:$28 sps:$4 sm:$0xff]   ;;  %v4364_v47 = vld [vmem:[%s5530_s3 + $0x50] ss:$8 sps:$4 sm:$0xff]  }
  0x76   : > { %1908 = vmatprep.mubr.bf16.mxu1 %v4218_v48  ;;  %2030 = vmatpush2.bf16.msra.mxu0 %v4258_v49  ;;  %v4373_v48 = vld [vmem:[%s5530_s3 + $0x44] ss:$8 sps:$4 sm:$0xff]   ;;  %v4371_v49 = vld [vmem:[%s5530_s3 + $0x40] ss:$8 sps:$4 sm:$0xff]  }
  0x77   : > { %2031 = vmatprep.subr.bf16.mxu0 %v4269_v50  ;;  %v4380_v50 = vld [vmem:[%s5530_s3 + $0x34] ss:$8 sps:$4 sm:$0xff]  }
  0x7a   : > { %2032 = vmatpush2.bf16.msra.mxu0 %v4267_v52  ;;  %v4317_v52 = vld [vmem:[%s4634_s12 + $0x88] ss:$28 sps:$4 sm:$0xff]  }
  0x7b   : > { %2033 = vmatprep.subr.bf16.mxu0 %v4278_v53  ;;  %v4318_v53 = vld [vmem:[%s4634_s12 + $0xbc] ss:$28 sps:$4 sm:$0xff]  }
  0x7c   : > { %1716 = vmatmul.mubr.bf16.gmra.mxu0 %v4220_v51  ;;  %v4316_v51 = vld [vmem:[%s4634_s12 + $0x80] ss:$28 sps:$4 sm:$0xff]  }
  0x7d   : > { %1909 = vmatmul.mubr.bf16.gmra.mxu1 %v4221_v54  ;;  %1725 = vmatprep.mubr.bf16.mxu0 %v4225_v55  ;;  %v4378_v54 = vld [vmem:[%s5530_s3 + $0x30] ss:$8 sps:$4 sm:$0xff]   ;;  %v4387_v55 = vld [vmem:[%s5530_s3 + $0x24] ss:$8 sps:$4 sm:$0xff]  }
  0x7e   : > { %1918 = vmatprep.mubr.bf16.mxu1 %v4227_v56  ;;  %2034 = vmatpush2.bf16.msra.mxu0 %v4276_v57  ;;  %v4385_v56 = vld [vmem:[%s5530_s3 + $0x20] ss:$8 sps:$4 sm:$0xff]   ;;  %v4390_v57 = vld [vmem:[%s5530_s3 + $0x14] ss:$8 sps:$4 sm:$0xff]  }
  0x7f   : > { %2035 = vmatprep.subr.bf16.mxu0 %v4287_v58  ;;  %v4320_v58 = vld [vmem:[%s4634_s12 + $0xb8] ss:$28 sps:$4 sm:$0xff]  }
  0x82   : > { %2036 = vmatpush2.bf16.msra.mxu0 %v4285_v59  ;;  %v4321_v59 = vld [vmem:[%s4634_s12 + $0xc0] ss:$28 sps:$4 sm:$0xff]  }
  0x83   : > { %2037 = vmatprep.subr.bf16.mxu0 %v4296_v61  ;;  %v4388_v61 = vld [vmem:[%s5530_s3 + $0x10] ss:$8 sps:$4 sm:$0xff]  }
  0x84   : > { %1726 = vmatmul.mubr.bf16.gmra.mxu0 %v4229_v60  ;;  %v4322_v60 = vld [vmem:[%s4634_s12 + $0xf4] ss:$28 sps:$4 sm:$0xff]  }
  0x85   : > { %1919 = vmatmul.mubr.bf16.gmra.mxu1 %v4230_v62  ;;  %1735 = vmatprep.mubr.bf16.mxu0 %v4234_v63  ;;  %v4393_v62 = vld [vmem:[%s5530_s3 + $0x4] ss:$8 sps:$4 sm:$0xff]   ;;  %v4391_v63 = vld [vmem:[%s5530_s3] ss:$8 sps:$4 sm:$0xff]  }
  0x86   : > { %1928 = vmatprep.mubr.bf16.mxu1 %v4236_v0  ;;  %2038 = vmatpush2.bf16.msra.mxu0 %v4294_v1  ;;  %v4396_v0 = vld [vmem:[%s5530_s3 + $0xf4] ss:$8 sps:$4 sm:$0xff]   ;;  %v4324_v1 = vld [vmem:[%s4634_s12 + $0xf0] ss:$28 sps:$4 sm:$0xff]  }
  0x87   : > { %2039 = vmatprep.subr.bf16.mxu0 %v4305_v2  ;;  %v4325_v2 = vld [vmem:[%s4634_s12 + $0xf8] ss:$28 sps:$4 sm:$0xff]  }
  0x8a   : > { %2040 = vmatpush2.bf16.msra.mxu0 %v4303_v4  ;;  %v4394_v4 = vld [vmem:[%s5530_s3 + $0xf0] ss:$8 sps:$4 sm:$0xff]  }
  0x8b   : > { %2695 = vmatprep.subr.bf16.mxu0 %v4352_v19  ;;  %v4408_v19 = vld [vmem:[%s5530_s3 + $0xb4] ss:$8 sps:$4 sm:$0xff]  }
  0x8c   : > { %1736 = vmatmul.mubr.bf16.gmra.mxu0 %v4238_v3  ;;  %v4326_v3 = vld [vmem:[%s4634_s12 + $0x12c] ss:$28 sps:$4 sm:$0xff]  }
  0x8d   : > { %1929 = vmatmul.mubr.bf16.gmra.mxu1 %v4239_v5  ;;  %1745 = vmatprep.mubr.bf16.mxu0 %v4243_v6  ;;  %v4399_v5 = vld [vmem:[%s5530_s3 + $0xe4] ss:$8 sps:$4 sm:$0xff]   ;;  %v4397_v6 = vld [vmem:[%s5530_s3 + $0xe0] ss:$8 sps:$4 sm:$0xff]  }
  0x8e   : > { %1938 = vmatprep.mubr.bf16.mxu1 %v4245_v7  ;;  %v4402_v7 = vld [vmem:[%s5530_s3 + $0xd4] ss:$8 sps:$4 sm:$0xff]  }
  0x94   : > { %1746 = vmatmul.mubr.bf16.gmra.mxu0 %v4247_v8  ;;  %v4328_v8 = vld [vmem:[%s4634_s12 + $0x128] ss:$28 sps:$4 sm:$0xff]  }
  0x95   : > { %1939 = vmatmul.mubr.bf16.gmra.mxu1 %v4248_v9  ;;  %1755 = vmatprep.mubr.bf16.mxu0 %v4252_v10  ;;  %v4329_v9 = vld [vmem:[%s4634_s12 + $0x130] ss:$28 sps:$4 sm:$0xff]   ;;  %v4330_v10 = vld [vmem:[%s4634_s12 + $0x164] ss:$28 sps:$4 sm:$0xff]  }
  0x96   : > { %1948 = vmatprep.mubr.bf16.mxu1 %v4254_v11  ;;  %v4400_v11 = vld [vmem:[%s5530_s3 + $0xd0] ss:$8 sps:$4 sm:$0xff]  }
  0x9c   : > { %1756 = vmatmul.mubr.bf16.gmra.mxu0 %v4256_v12  ;;  %v4403_v12 = vld [vmem:[%s5530_s3 + $0xc0] ss:$8 sps:$4 sm:$0xff]  }
  0x9d   : > { %1949 = vmatmul.mubr.bf16.gmra.mxu1 %v4257_v13  ;;  %1765 = vmatprep.mubr.bf16.mxu0 %v4261_v14  ;;  %v4405_v13 = vld [vmem:[%s5530_s3 + $0xc4] ss:$8 sps:$4 sm:$0xff]   ;;  %v4332_v14 = vld [vmem:[%s4634_s12 + $0x160] ss:$28 sps:$4 sm:$0xff]  }
  0x9e   : > { %1958 = vmatprep.mubr.bf16.mxu1 %v4263_v15  ;;  %v4333_v15 = vld [vmem:[%s4634_s12 + $0x168] ss:$28 sps:$4 sm:$0xff]  }
  0xa4   : > { %1766 = vmatmul.mubr.bf16.gmra.mxu0 %v4265_v16  ;;  %v4334_v16 = vld [vmem:[%s4634_s12 + $0x19c] ss:$28 sps:$4 sm:$0xff]  }
  0xa5   : > { %1959 = vmatmul.mubr.bf16.gmra.mxu1 %v4266_v17  ;;  %1775 = vmatprep.mubr.bf16.mxu0 %v4270_v18  ;;  %v514_v17 = vlaneseq  ;;  %v4406_v18 = vld [vmem:[%s5530_s3 + $0xb0] ss:$8 sps:$4 sm:$0xff]  }
  0xa6   : > { %1968 = vmatprep.mubr.bf16.mxu1 %v4272_v20  ;;  %v4336_v20 = vld [vmem:[%s4634_s12 + $0x198] ss:$28 sps:$4 sm:$0xff]  }
  0xac   : > { %1776 = vmatmul.mubr.bf16.gmra.mxu0 %v4274_v21  ;;  %v4337_v21 = vld [vmem:[%s4634_s12 + $0x1a0] ss:$28 sps:$4 sm:$0xff]  }
  0xad   : > { %1969 = vmatmul.mubr.bf16.gmra.mxu1 %v4275_v22  ;;  %1785 = vmatprep.mubr.bf16.mxu0 %v4279_v23  ;;  %v4338_v22 = vld [vmem:[%s4634_s12 + $0x1d4] ss:$28 sps:$4 sm:$0xff]   ;;  %v4977_v23 = vshrl.u32 %v514_v17, 7 }
  0xae   : > { %1978 = vmatprep.mubr.bf16.mxu1 %v4281_v24 }
  0xaf   : > { %5539 = vst [vmem:[#allocation2_spill] sm:$0xff] %v4977_v23  ;;  %v5535_v24 = vsub.s32 0, %v4977_v23 }
  0xb4   : > { %1786 = vmatmul.mubr.bf16.gmra.mxu0 %v4283_v25  ;;  %v512_v25 = vld [vmem:[%s5529_s2] sm:$0x3] }
  0xb5   : > { %1979 = vmatmul.mubr.bf16.gmra.mxu1 %v4284_v26  ;;  %1795 = vmatprep.mubr.bf16.mxu0 %v4288_v27  ;;  %v5536_v26 = vsub.s32 1, %v4977_v23  ;;  %v4409_v27 = vld [vmem:[%s5530_s3 + $0xa0] ss:$8 sps:$4 sm:$0xff]  }
  0xb6   : > { %1988 = vmatprep.mubr.bf16.mxu1 %v4290_v28  ;;  %v4411_v28 = vld [vmem:[%s5530_s3 + $0xa4] ss:$8 sps:$4 sm:$0xff]  }
  0xbc   : > { %1796 = vmatmul.mubr.bf16.gmra.mxu0 %v4292_v29  ;;  %v4340_v29 = vld [vmem:[%s4634_s12 + $0x1d0] ss:$28 sps:$4 sm:$0xff]  }
  0xbd   : > { %1989 = vmatmul.mubr.bf16.gmra.mxu1 %v4293_v30  ;;  %1805 = vmatprep.mubr.bf16.mxu0 %v4297_v31  ;;  %v4341_v30 = vld [vmem:[%s4634_s12 + $0x1d8] ss:$28 sps:$4 sm:$0xff]   ;;  %v4996_v31 = vrot.slane %v512_v25, %v5535_v24 }
  0xbe   : > { %1998 = vmatprep.mubr.bf16.mxu1 %v4299_v32  ;;  %v4342_v32 = vld [vmem:[%s4634_s12 + $0x20c] ss:$28 sps:$4 sm:$0xff]  }
  0xc4   : > { %1806 = vmatmul.mubr.bf16.gmra.mxu0 %v4301_v33  ;;  %v5001_v33 = vrot.slane %v512_v25, %v5536_v26  ;;  %v4356_v25 = vld [vmem:[%s4634_s12 + $0x280] ss:$28 sps:$4 sm:$0xff]  }
  0xc5   : > { %1999 = vmatmul.mubr.bf16.gmra.mxu1 %v4302_v34  ;;  %2041 = vmatprep.mubr.bf16.mxu0 %v4308_v35 }
  0xc6   : > { %2234 = vmatprep.mubr.bf16.mxu1 %v4442_v36 }
  0xcc   : > { %2042 = vmatmul.mubr.bf16.vlgmr.msra.gmra.mxu0 %v4306_v37 }
  0xcd   : > { %3715 = vmatmul.mubr.msk.bf16.vlgmr.msra.gmra.mxu1 %vm1574_vm0, %v4309_v38  ;;  %2051 = vmatprep.mubr.bf16.mxu0 %v4310_v39 }
  0xce   : > { %2244 = vmatprep.mubr.bf16.mxu1 %v4442_v36  ;;  %2696 = vmatpush1.bf16.msra.mxu0 %v4350_v40 }
  0xcf   : > { %2697 = vmatprep.subr.bf16.mxu0 %v4359_v41 }
  0xd2   : > { %2698 = vmatpush1.bf16.msra.mxu0 %v4357_v42 }
  0xd3   : > { %2699 = vmatprep.subr.bf16.mxu0 %v4366_v43 }
  0xd4   : > { %2052 = vmatmul.mubr.bf16.gmra.mxu0 %v4312_v44  ;;  %v4344_v44 = vld [vmem:[%s4634_s12 + $0x208] ss:$28 sps:$4 sm:$0xff]  }
  0xd5   : > { %3716 = vmatmul.mubr.msk.bf16.gmra.mxu1 %vm1574_vm0, %v4313_v45  ;;  %2061 = vmatprep.mubr.bf16.mxu0 %v4314_v46  ;;  %v4345_v45 = vld [vmem:[%s4634_s12 + $0x210] ss:$28 sps:$4 sm:$0xff]  }
  0xd6   : > { %2254 = vmatprep.mubr.bf16.mxu1 %v4442_v36  ;;  %2700 = vmatpush1.bf16.msra.mxu0 %v4364_v47 }
  0xd7   : > { %2701 = vmatprep.subr.bf16.mxu0 %v4373_v48  ;;  %v4346_v48 = vld [vmem:[%s4634_s12 + $0x244] ss:$28 sps:$4 sm:$0xff]  }
  0xda   : > { %2702 = vmatpush1.bf16.msra.mxu0 %v4371_v49  ;;  %v4414_v49 = vld [vmem:[%s5530_s3 + $0x94] ss:$8 sps:$4 sm:$0xff]  }
  0xdb   : > { %2703 = vmatprep.subr.bf16.mxu0 %v4380_v50 }
  0xdc   : > { %2062 = vmatmul.mubr.bf16.gmra.mxu0 %v4316_v51 }
  0xdd   : > { %3717 = vmatmul.mubr.msk.bf16.gmra.mxu1 %vm1574_vm0, %v4317_v52  ;;  %2071 = vmatprep.mubr.bf16.mxu0 %v4318_v53  ;;  %v4412_v52 = vld [vmem:[%s5530_s3 + $0x90] ss:$8 sps:$4 sm:$0xff]  }
  0xde   : > { %2264 = vmatprep.mubr.bf16.mxu1 %v4442_v36  ;;  %2704 = vmatpush1.bf16.msra.mxu0 %v4378_v54 }
  0xdf   : > { %2705 = vmatprep.subr.bf16.mxu0 %v4387_v55 }
  0xe2   : > { %2706 = vmatpush1.bf16.msra.mxu0 %v4385_v56 }
  0xe3   : > { %2707 = vmatprep.subr.bf16.mxu0 %v4390_v57 }
  0xe4   : > { %2072 = vmatmul.mubr.bf16.gmra.mxu0 %v4320_v58 }
  0xe5   : > { %3718 = vmatmul.mubr.msk.bf16.gmra.mxu1 %vm1574_vm0, %v4321_v59  ;;  %2081 = vmatprep.mubr.bf16.mxu0 %v4322_v60 }
  0xe6   : > { %2274 = vmatprep.mubr.bf16.mxu1 %v4442_v36  ;;  %2708 = vmatpush1.bf16.msra.mxu0 %v4388_v61  ;;  %v4417_v61 = vld [vmem:[%s5530_s3 + $0x84] ss:$8 sps:$4 sm:$0xff]  }
  0xe7   : > { %2709 = vmatprep.subr.bf16.mxu0 %v4393_v62 }
  0xea   : > { %2710 = vmatpush1.bf16.msra.mxu0 %v4391_v63 }
  0xeb   : > { %2711 = vmatprep.subr.bf16.mxu0 %v4396_v0  ;;  %v4415_v0 = vld [vmem:[%s5530_s3 + $0x80] ss:$8 sps:$4 sm:$0xff]  }
  0xec   : > { %2082 = vmatmul.mubr.bf16.gmra.mxu0 %v4324_v1 }
  0xed   : > { %3719 = vmatmul.mubr.msk.bf16.gmra.mxu1 %vm1574_vm0, %v4325_v2  ;;  %2091 = vmatprep.mubr.bf16.mxu0 %v4326_v3  ;;  %v4348_v3 = vld [vmem:[%s4634_s12 + $0x240] ss:$28 sps:$4 sm:$0xff]  }
  0xee   : > { %2284 = vmatprep.mubr.bf16.mxu1 %v4442_v36  ;;  %2712 = vmatpush2.bf16.msra.mxu0 %v4394_v4  ;;  %v4349_v4 = vld [vmem:[%s4634_s12 + $0x248] ss:$28 sps:$4 sm:$0xff]  }
  0xef   : > { %2713 = vmatprep.subr.bf16.mxu0 %v4399_v5 }
  0xf2   : > { %2714 = vmatpush2.bf16.msra.mxu0 %v4397_v6 }
  0xf3   : > { %2715 = vmatprep.subr.bf16.mxu0 %v4402_v7  ;;  %v4353_v7 = vld [vmem:[%s4634_s12 + $0x27c] ss:$28 sps:$4 sm:$0xff]  }
  0xf4   : > { %2092 = vmatmul.mubr.bf16.gmra.mxu0 %v4328_v8 }
  0xf5   : > { %3720 = vmatmul.mubr.msk.bf16.gmra.mxu1 %vm1574_vm0, %v4329_v9  ;;  %2101 = vmatprep.mubr.bf16.mxu0 %v4330_v10 }
  0xf6   : > { %2294 = vmatprep.mubr.bf16.mxu1 %v4442_v36  ;;  %2716 = vmatpush2.bf16.msra.mxu0 %v4400_v11 }
  0xf7   : > { %2717 = vmatprep.subr.bf16.mxu0 %v4405_v13 }
  0xfa   : > { %2718 = vmatpush2.bf16.msra.mxu0 %v4403_v12 }
  0xfb   : > { %2719 = vmatprep.subr.bf16.mxu0 %v4408_v19 }
  0xfc   : > { %2102 = vmatmul.mubr.bf16.gmra.mxu0 %v4332_v14 }
  0xfd   : > { %3721 = vmatmul.mubr.msk.bf16.gmra.mxu1 %vm1574_vm0, %v4333_v15  ;;  %2111 = vmatprep.mubr.bf16.mxu0 %v4334_v16 }
  0xfe   : > { %2304 = vmatprep.mubr.bf16.mxu1 %v4442_v36  ;;  %2720 = vmatpush2.bf16.msra.mxu0 %v4406_v18 }
  0xff   : > { %2721 = vmatprep.subr.bf16.mxu0 %v4411_v28 }
 0x102   : > { %2722 = vmatpush2.bf16.msra.mxu0 %v4409_v27 }
 0x103   : > { %2723 = vmatprep.subr.bf16.mxu0 %v4414_v49  ;;  %v4360_v49 = vld [vmem:[%s4634_s12 + $0x2b0] ss:$28 sps:$4 sm:$0xff]  }
 0x104   : > { %2112 = vmatmul.mubr.bf16.gmra.mxu0 %v4336_v20 }
 0x105   : > { %3722 = vmatmul.mubr.msk.bf16.gmra.mxu1 %vm1574_vm0, %v4337_v21  ;;  %2121 = vmatprep.mubr.bf16.mxu0 %v4338_v22  ;;  %v4355_v22 = vld [vmem:[%s4634_s12 + $0x278] ss:$28 sps:$4 sm:$0xff]  }
 0x106   : > { %2314 = vmatprep.mubr.bf16.mxu1 %v4442_v36  ;;  %2724 = vmatpush2.bf16.msra.mxu0 %v4412_v52 }
 0x107   : > { %2725 = vmatprep.subr.bf16.mxu0 %v4417_v61 }
 0x10a   : > { %2726 = vmatpush2.bf16.msra.mxu0 %v4415_v0 }
 0x10c   : > { %v1657_v34 = vpop.f32.mrf.mxu0  ;;  %2122 = vmatmul.mubr.bf16.gmra.mxu0 %v4340_v29  ;;  %v4362_v29 = vld [vmem:[%s4634_s12 + $0x2b4] ss:$28 sps:$4 sm:$0xff]  }
 0x10d   : > { %v1850_v35 = vpop.f32.mrf.mxu1  ;;  %3723 = vmatmul.mubr.msk.bf16.gmra.mxu1 %vm1574_vm0, %v4341_v30  ;;  %v1658_v37 = vadd.f32 %v1657_v34, %v4996_v31  ;;  %2131 = vmatprep.mubr.bf16.mxu0 %v4342_v32 }
 0x10e   : > { %2324 = vmatprep.mubr.bf16.mxu1 %v4442_v36  ;;  %v1659_v38 = vpop.f32.mrf.mxu0 }
 0x10f   : > { %v1852_v39 = vpop.f32.mrf.mxu1  ;;  %v5006_v40 = vadd.f32 %v1850_v35, %v1658_v37  ;;  %v1660_v41 = vadd.f32 %v1659_v38, %v5001_v33 }
 0x110   : > { %v1661_v42 = vpop.f32.mrf.mxu0 }
 0x111   : > { %v1854_v43 = vpop.f32.mrf.mxu1  ;;  %v5011_v46 = vadd.f32 %v1852_v39, %v1660_v41  ;;  %v1662_v47 = vadd.f32 %v1661_v42, %v4996_v31 }
 0x112   : > { %v1663_v50 = vpop.f32.mrf.mxu0 }
 0x113   : > { %v1856_v51 = vpop.f32.mrf.mxu1  ;;  %v5021_v53 = vadd.f32 %v1854_v43, %v1662_v47  ;;  %v1664_v54 = vadd.f32 %v1663_v50, %v5001_v33  ;;  %v4363_v50 = vld [vmem:[%s4634_s12 + $0x2b8] ss:$28 sps:$4 sm:$0xff]  }
 0x114   : > { %v1667_v55 = vpop.f32.mrf.mxu0  ;;  %2132 = vmatmul.mubr.bf16.gmra.mxu0 %v4344_v44 }
 0x115   : > { %v1860_v56 = vpop.f32.mrf.mxu1  ;;  %3724 = vmatmul.mubr.msk.bf16.gmra.mxu1 %vm1574_vm0, %v4345_v45  ;;  %v5025_v57 = vadd.f32 %v1856_v51, %v1664_v54  ;;  %v1668_v58 = vadd.f32 %v1667_v55, %v4996_v31  ;;  %2141 = vmatprep.mubr.bf16.mxu0 %v4346_v48  ;;  %v4369_v54 = vld [vmem:[%s4634_s12 + $0x2ec] ss:$28 sps:$4 sm:$0xff]  }
 0x116   : > { %2334 = vmatprep.mubr.bf16.mxu1 %v4442_v36  ;;  %v1669_v59 = vpop.f32.mrf.mxu0 }
 0x117   : > { %v1862_v60 = vpop.f32.mrf.mxu1  ;;  %v5032_v62 = vadd.f32 %v1860_v56, %v1668_v58  ;;  %v1670_v63 = vadd.f32 %v1669_v59, %v5001_v33 }
 0x118   : > { %v1671_v1 = vpop.f32.mrf.mxu0 }
 0x119   : > { %v1864_v2 = vpop.f32.mrf.mxu1  ;;  %v5040_v5 = vadd.f32 %v1862_v60, %v1670_v63  ;;  %v1672_v6 = vadd.f32 %v1671_v1, %v4996_v31 }
 0x11a   : > { %v1673_v8 = vpop.f32.mrf.mxu0 }
 0x11b   : > { %v1866_v9 = vpop.f32.mrf.mxu1  ;;  %v5044_v10 = vadd.f32 %v1864_v2, %v1672_v6  ;;  %v1674_v11 = vadd.f32 %v1673_v8, %v5001_v33  ;;  %v4367_v8 = vld [vmem:[%s4634_s12 + $0x2e8] ss:$28 sps:$4 sm:$0xff]  }
 0x11c   : > { %v1677_v12 = vpop.f32.mrf.mxu0  ;;  %2142 = vmatmul.mubr.bf16.gmra.mxu0 %v4348_v3 }
 0x11d   : > { %v1870_v13 = vpop.f32.mrf.mxu1  ;;  %3725 = vmatmul.mubr.msk.bf16.gmra.mxu1 %vm1574_vm0, %v4349_v4  ;;  %v5048_v14 = vadd.f32 %v1866_v9, %v1674_v11  ;;  %v1678_v15 = vadd.f32 %v1677_v12, %v4996_v31  ;;  %2151 = vmatprep.mubr.bf16.mxu0 %v4353_v7  ;;  %v4370_v9 = vld [vmem:[%s4634_s12 + $0x2f0] ss:$28 sps:$4 sm:$0xff]  }
 0x11e   : > { %2344 = vmatprep.mubr.bf16.mxu1 %v4442_v36  ;;  %v1679_v16 = vpop.f32.mrf.mxu0 }
 0x11f   : > { %v1872_v17 = vpop.f32.mrf.mxu1  ;;  %v5052_v18 = vadd.f32 %v1870_v13, %v1678_v15  ;;  %v1680_v19 = vadd.f32 %v1679_v16, %v5001_v33  ;;  %v4376_v13 = vld [vmem:[%s4634_s12 + $0x324] ss:$28 sps:$4 sm:$0xff]  }
 0x120   : > { %v1681_v20 = vpop.f32.mrf.mxu0 }
 0x121   : > { %v1874_v21 = vpop.f32.mrf.mxu1  ;;  %v5057_v27 = vadd.f32 %v1872_v17, %v1680_v19  ;;  %v1682_v28 = vadd.f32 %v1681_v20, %v4996_v31 }
 0x122   : > { %v1683_v30 = vpop.f32.mrf.mxu0 }
 0x123   : > { %v1876_v32 = vpop.f32.mrf.mxu1  ;;  %v5061_v34 = vadd.f32 %v1874_v21, %v1682_v28  ;;  %v1684_v35 = vadd.f32 %v1683_v30, %v5001_v33 }
 0x124   : > { %v1687_v37 = vpop.f32.mrf.mxu0  ;;  %2152 = vmatmul.mubr.bf16.gmra.mxu0 %v4355_v22 }
 0x125   : > { %v1880_v38 = vpop.f32.mrf.mxu1  ;;  %3726 = vmatmul.mubr.msk.bf16.gmra.mxu1 %vm1574_vm0, %v4356_v25  ;;  %v5065_v39 = vadd.f32 %v1876_v32, %v1684_v35  ;;  %v1688_v41 = vadd.f32 %v1687_v37, %v4996_v31  ;;  %2161 = vmatprep.mubr.bf16.mxu0 %v4362_v29  ;;  %v4374_v35 = vld [vmem:[%s4634_s12 + $0x320] ss:$28 sps:$4 sm:$0xff]   ;;  %v4377_v37 = vld [vmem:[%s4634_s12 + $0x328] ss:$28 sps:$4 sm:$0xff]  }
 0x126   : > { %2354 = vmatprep.mubr.bf16.mxu1 %v4442_v36  ;;  %v1689_v42 = vpop.f32.mrf.mxu0 }
 0x127   : > { %v1882_v43 = vpop.f32.mrf.mxu1  ;;  %v5069_v44 = vadd.f32 %v1880_v38, %v1688_v41  ;;  %v1690_v45 = vadd.f32 %v1689_v42, %v5001_v33  ;;  %v4383_v42 = vld [vmem:[%s4634_s12 + $0x35c] ss:$28 sps:$4 sm:$0xff]  }
 0x128   : > { %v1691_v47 = vpop.f32.mrf.mxu0 }
 0x129   : > { %v1884_v48 = vpop.f32.mrf.mxu1  ;;  %v5074_v51 = vadd.f32 %v1882_v43, %v1690_v45  ;;  %v1692_v52 = vadd.f32 %v1691_v47, %v4996_v31 }
 0x12a   : > { %v1693_v55 = vpop.f32.mrf.mxu0 }
 0x12b   : > { %v1886_v56 = vpop.f32.mrf.mxu1  ;;  %v5078_v58 = vadd.f32 %v1884_v48, %v1692_v52  ;;  %v1694_v59 = vadd.f32 %v1693_v55, %v5001_v33 }
 0x12c   : > { %v1697_v60 = vpop.f32.mrf.mxu0  ;;  %2162 = vmatmul.mubr.bf16.gmra.mxu0 %v4360_v49 }
 0x12d   : > { %v1890_v61 = vpop.f32.mrf.mxu1  ;;  %3727 = vmatmul.mubr.msk.bf16.gmra.mxu1 %vm1574_vm0, %v4363_v50  ;;  %v5082_v63 = vadd.f32 %v1886_v56, %v1694_v59  ;;  %v1698_v0 = vadd.f32 %v1697_v60, %v4996_v31  ;;  %2171 = vmatprep.mubr.bf16.mxu0 %v4369_v54 }
 0x12e   : > { %2364 = vmatprep.mubr.bf16.mxu1 %v4442_v36  ;;  %v1699_v1 = vpop.f32.mrf.mxu0 }
 0x12f   : > { %v1892_v2 = vpop.f32.mrf.mxu1  ;;  %v5086_v3 = vadd.f32 %v1890_v61, %v1698_v0  ;;  %v1700_v4 = vadd.f32 %v1699_v1, %v5001_v33  ;;  %v4381_v61 = vld [vmem:[%s4634_s12 + $0x358] ss:$28 sps:$4 sm:$0xff]   ;;  %v4384_v0 = vld [vmem:[%s4634_s12 + $0x360] ss:$28 sps:$4 sm:$0xff]  }
 0x130   : > { %v1701_v6 = vpop.f32.mrf.mxu0 }
 0x131   : > { %v1894_v7 = vpop.f32.mrf.mxu1  ;;  %v5091_v11 = vadd.f32 %v1892_v2, %v1700_v4  ;;  %v1702_v12 = vadd.f32 %v1701_v6, %v4996_v31 }
 0x132   : > { %v5095_v15 = vpop.f32.mrf.mxu0 }
 0x133   : > { %v5097_v16 = vpop.f32.mrf.mxu1  ;;  %v5099_v17 = vadd.f32 %v1894_v7, %v1702_v12 }
 0x134   : > { %v1707_v19 = vpop.f32.mrf.mxu0  ;;  %2172 = vmatmul.mubr.bf16.gmra.mxu0 %v4367_v8 }
 0x135   : > { %v1900_v20 = vpop.f32.mrf.mxu1  ;;  %3728 = vmatmul.mubr.msk.bf16.gmra.mxu1 %vm1574_vm0, %v4370_v9  ;;  %v1708_v21 = vadd.f32 %v1707_v19, %v4996_v31  ;;  %2181 = vmatprep.mubr.bf16.mxu0 %v4376_v13 }
 0x136   : > { %2374 = vmatprep.mubr.bf16.mxu1 %v4442_v36  ;;  %v1709_v22 = vpop.f32.mrf.mxu0 }
 0x137   : > { %v1902_v25 = vpop.f32.mrf.mxu1  ;;  %v5104_v28 = vadd.f32 %v1900_v20, %v1708_v21  ;;  %v1710_v29 = vadd.f32 %v1709_v22, %v5001_v33 }
 0x138   : > { %v1711_v30 = vpop.f32.mrf.mxu0 }
 0x139   : > { %v1904_v32 = vpop.f32.mrf.mxu1  ;;  %v5109_v38 = vadd.f32 %v1902_v25, %v1710_v29  ;;  %v1712_v41 = vadd.f32 %v1711_v30, %v4996_v31 }
 0x13a   : > { %v5113_v43 = vpop.f32.mrf.mxu0 }
 0x13b   : > { %v5115_v45 = vpop.f32.mrf.mxu1  ;;  %v5117_v47 = vadd.f32 %v1904_v32, %v1712_v41 }
 0x13c   : > { %v1717_v48 = vpop.f32.mrf.mxu0  ;;  %2182 = vmatmul.mubr.bf16.gmra.mxu0 %v4374_v35 }
 0x13d   : > { %v1910_v49 = vpop.f32.mrf.mxu1  ;;  %3729 = vmatmul.mubr.msk.bf16.gmra.mxu1 %vm1574_vm0, %v4377_v37  ;;  %v1718_v50 = vadd.f32 %v1717_v48, %v4996_v31  ;;  %2191 = vmatprep.mubr.bf16.mxu0 %v4383_v42 }
 0x13e   : > { %2384 = vmatprep.mubr.bf16.mxu1 %v4442_v36  ;;  %v1719_v52 = vpop.f32.mrf.mxu0 }
 0x13f   : > { %v1912_v54 = vpop.f32.mrf.mxu1  ;;  %v5122_v55 = vadd.f32 %v1910_v49, %v1718_v50  ;;  %v1720_v56 = vadd.f32 %v1719_v52, %v5001_v33 }
 0x140   : > { %v1721_v59 = vpop.f32.mrf.mxu0 }
 0x141   : > { %v1914_v60 = vpop.f32.mrf.mxu1  ;;  %v5127_v1 = vadd.f32 %v1912_v54, %v1720_v56  ;;  %v1722_v2 = vadd.f32 %v1721_v59, %v4996_v31 }
 0x142   : > { %v5130_v4 = vpop.f32.mrf.mxu0 }
 0x143   : > { %v5132_v6 = vpop.f32.mrf.mxu1  ;;  %v5134_v7 = vadd.f32 %v1914_v60, %v1722_v2 }
 0x144   : > { %v1727_v36 = vpop.f32.mrf.mxu0  ;;  %2192 = vmatmul.mubr.bf16.gmra.mxu0 %v4381_v61 }
 0x145   : > { %v1920_v8 = vpop.f32.mrf.mxu1  ;;  %3730 = vmatmul.mubr.msk.bf16.gmra.mxu1 %vm1574_vm0, %v4384_v0  ;;  %v1728_v9 = vadd.f32 %v1727_v36, %v4996_v31 }
 0x146   : > { %v1729_v12 = vpop.f32.mrf.mxu0 }
 0x147   : > { %v1922_v13 = vpop.f32.mrf.mxu1  ;;  %v5138_v19 = vadd.f32 %v1920_v8, %v1728_v9  ;;  %v1730_v20 = vadd.f32 %v1729_v12, %v5001_v33 }
 0x148   : > { %v1731_v21 = vpop.f32.mrf.mxu0 }
 0x149   : > { %v1924_v22 = vpop.f32.mrf.mxu1  ;;  %v5141_v25 = vadd.f32 %v1922_v13, %v1730_v20  ;;  %v1732_v29 = vadd.f32 %v1731_v21, %v4996_v31 }
 0x14a   : > { %v5144_v30 = vpop.f32.mrf.mxu0 }
 0x14b   : > { %v5146_v32 = vpop.f32.mrf.mxu1  ;;  %v5148_v35 = vadd.f32 %v1924_v22, %v1732_v29 }
 0x14c   : > { %v1737_v37 = vpop.f32.mrf.mxu0 }
 0x14d   : > { %v1930_v41 = vpop.f32.mrf.mxu1  ;;  %v1738_v42 = vadd.f32 %v1737_v37, %v4996_v31 }
 0x14e   : > { %v1739_v48 = vpop.f32.mrf.mxu0 }
 0x14f   : > { %v1932_v49 = vpop.f32.mrf.mxu1  ;;  %v5151_v50 = vadd.f32 %v1930_v41, %v1738_v42  ;;  %v1740_v52 = vadd.f32 %v1739_v48, %v5001_v33 }
 0x150   : > { %v1741_v54 = vpop.f32.mrf.mxu0 }
 0x151   : > { %v1934_v56 = vpop.f32.mrf.mxu1  ;;  %v5154_v59 = vadd.f32 %v1932_v49, %v1740_v52  ;;  %v1742_v60 = vadd.f32 %v1741_v54, %v4996_v31 }
 0x152   : > { %v5157_v61 = vpop.f32.mrf.mxu0 }
 0x153   : > { %v5159_v0 = vpop.f32.mrf.mxu1  ;;  %v5161_v2 = vadd.f32 %v1934_v56, %v1742_v60 }
 0x154   : > { %v1747_v36 = vpop.f32.mrf.mxu0 }
 0x155   : > { %v1940_v8 = vpop.f32.mrf.mxu1  ;;  %v1748_v9 = vadd.f32 %v1747_v36, %v4996_v31 }
 0x156   : > { %v1749_v12 = vpop.f32.mrf.mxu0 }
 0x157   : > { %v1942_v13 = vpop.f32.mrf.mxu1  ;;  %v5164_v20 = vadd.f32 %v1940_v8, %v1748_v9  ;;  %v1750_v21 = vadd.f32 %v1749_v12, %v5001_v33 }
 0x158   : > { %v1751_v22 = vpop.f32.mrf.mxu0 }
 0x159   : > { %v1944_v29 = vpop.f32.mrf.mxu1  ;;  %v5167_v37 = vadd.f32 %v1942_v13, %v1750_v21  ;;  %v1752_v41 = vadd.f32 %v1751_v22, %v4996_v31 }
 0x15a   : > { %v5170_v42 = vpop.f32.mrf.mxu0 }
 0x15b   : > { %v5172_v48 = vpop.f32.mrf.mxu1  ;;  %v5174_v49 = vadd.f32 %v1944_v29, %v1752_v41 }
 0x15c   : > { %v1757_v52 = vpop.f32.mrf.mxu0 }
 0x15d   : > { %5540 = vst [vmem:[#allocation3_spill] sm:$0xff] %v5174_v49  ;;  %v1950_v54 = vpop.f32.mrf.mxu1  ;;  %v1758_v56 = vadd.f32 %v1757_v52, %v4996_v31 }
 0x15e   : > { %v1759_v60 = vpop.f32.mrf.mxu0 }
 0x15f   : > { %v1952_v36 = vpop.f32.mrf.mxu1  ;;  %v5177_v8 = vadd.f32 %v1950_v54, %v1758_v56  ;;  %v1760_v9 = vadd.f32 %v1759_v60, %v5001_v33 }
 0x160   : > { %v1761_v12 = vpop.f32.mrf.mxu0 }
 0x161   : > { %5541 = vst [vmem:[#allocation4_spill] sm:$0xff] %v5177_v8  ;;  %v1954_v13 = vpop.f32.mrf.mxu1  ;;  %v5180_v21 = vadd.f32 %v1952_v36, %v1760_v9  ;;  %v1762_v22 = vadd.f32 %v1761_v12, %v4996_v31 }
 0x162   : > { %v5183_v24 = vpop.f32.mrf.mxu0 }
 0x163   : > { %5542 = vst [vmem:[#allocation5_spill] sm:$0xff] %v5180_v21  ;;  %5543 = vst [vmem:[#allocation6_spill] sm:$0xff] %v5183_v24  ;;  %v5185_v29 = vpop.f32.mrf.mxu1  ;;  %v5187_v41 = vadd.f32 %v1954_v13, %v1762_v22 }
 0x164   : > { %5544 = vst [vmem:[#allocation7_spill] sm:$0xff] %v5185_v29  ;;  %v1767_v26 = vpop.f32.mrf.mxu0 }
 0x165   : > { %5545 = vst [vmem:[#allocation8_spill] sm:$0xff] %v5187_v41  ;;  %v1960_v52 = vpop.f32.mrf.mxu1  ;;  %v1768_v23 = vadd.f32 %v1767_v26, %v4996_v31 }
 0x166   : > { %v1769_v54 = vpop.f32.mrf.mxu0 }
 0x167   : > { %v1962_v56 = vpop.f32.mrf.mxu1  ;;  %v5190_v8 = vadd.f32 %v1960_v52, %v1768_v23  ;;  %v1770_v60 = vadd.f32 %v1769_v54, %v5001_v33 }
 0x168   : > { %v1771_v36 = vpop.f32.mrf.mxu0 }
 0x169   : > { %5546 = vst [vmem:[#allocation9_spill] sm:$0xff] %v5190_v8  ;;  %v1964_v9 = vpop.f32.mrf.mxu1  ;;  %v5193_v21 = vadd.f32 %v1962_v56, %v1770_v60  ;;  %v1772_v12 = vadd.f32 %v1771_v36, %v4996_v31 }
 0x16a   : > { %v5196_v24 = vpop.f32.mrf.mxu0 }
 0x16b   : > { %5547 = vst [vmem:[#allocation10_spill] sm:$0xff] %v5193_v21  ;;  %5548 = vst [vmem:[#allocation11_spill] sm:$0xff] %v5196_v24  ;;  %v5198_v13 = vpop.f32.mrf.mxu1  ;;  %v5200_v22 = vadd.f32 %v1964_v9, %v1772_v12  ;;  %v4418_v9 = vld [vmem:[%s5532_s5 + $0x78] sm:$0xff]  }
 0x16c   : > { %5549 = vst [vmem:[#allocation12_spill] sm:$0xff] %v5198_v13  ;;  %v1777_v41 = vpop.f32.mrf.mxu0  ;;  %3941 = vmatprep.subr.bf16.mxu1 %v4418_v9 }
 0x16d   : > { %5550 = vst [vmem:[#allocation13_spill] sm:$0xff] %v5200_v22  ;;  %v1970_v26 = vpop.f32.mrf.mxu1  ;;  %v1778_v29 = vadd.f32 %v1777_v41, %v4996_v31  ;;  %v4419_v41 = vld [vmem:[%s5532_s5 + $0x38] sm:$0xff]  }
 0x16e   : > { %v1779_v23 = vpop.f32.mrf.mxu0  ;;  %3942 = vmatpush3.bf16.msra.mxu1 %v4419_v41 }
 0x16f   : > { %v1972_v52 = vpop.f32.mrf.mxu1  ;;  %v5203_v8 = vadd.f32 %v1970_v26, %v1778_v29  ;;  %v1780_v54 = vadd.f32 %v1779_v23, %v5001_v33 }
 0x170   : > { %v1781_v56 = vpop.f32.mrf.mxu0 }
 0x171   : > { %5551 = vst [vmem:[#allocation14_spill] sm:$0xff] %v5203_v8  ;;  %v1974_v60 = vpop.f32.mrf.mxu1  ;;  %v5206_v21 = vadd.f32 %v1972_v52, %v1780_v54  ;;  %v1782_v36 = vadd.f32 %v1781_v56, %v4996_v31 }
 0x172   : > { %v5215_v12 = vpop.f32.mrf.mxu0 }
 0x173   : > { %5552 = vst [vmem:[#allocation15_spill] sm:$0xff] %v5206_v21  ;;  %5553 = vst [vmem:[#allocation16_spill] sm:$0xff] %v5215_v12  ;;  %v5217_v29 = vpop.f32.mrf.mxu1  ;;  %v5219_v26 = vadd.f32 %v1974_v60, %v1782_v36 }
 0x174   : > { %5554 = vst [vmem:[#allocation17_spill] sm:$0xff] %v5217_v29  ;;  %v1787_v23 = vpop.f32.mrf.mxu0 }
 0x175   : > { %5555 = vst [vmem:[#allocation18_spill] sm:$0xff] %v5219_v26  ;;  %v1980_v52 = vpop.f32.mrf.mxu1  ;;  %v1788_v54 = vadd.f32 %v1787_v23, %v4996_v31 }
 0x176   : > { %v1789_v56 = vpop.f32.mrf.mxu0 }
 0x177   : > { %v1982_v21 = vpop.f32.mrf.mxu1  ;;  %v5222_v8 = vadd.f32 %v1980_v52, %v1788_v54  ;;  %v1790_v22 = vadd.f32 %v1789_v56, %v5001_v33 }
 0x178   : > { %v1791_v13 = vpop.f32.mrf.mxu0 }
 0x179   : > { %5556 = vst [vmem:[#allocation19_spill] sm:$0xff] %v5222_v8  ;;  %v1984_v24 = vpop.f32.mrf.mxu1  ;;  %v5225_v49 = vadd.f32 %v1982_v21, %v1790_v22  ;;  %v1792_v29 = vadd.f32 %v1791_v13, %v4996_v31 }
 0x17a   : > { %v5228_v60 = vpop.f32.mrf.mxu0 }
 0x17b   : > { %5557 = vst [vmem:[#allocation20_spill] sm:$0xff] %v5225_v49  ;;  %5558 = vst [vmem:[#allocation21_spill] sm:$0xff] %v5228_v60  ;;  %v5230_v36 = vpop.f32.mrf.mxu1  ;;  %v5232_v9 = vadd.f32 %v1984_v24, %v1792_v29  ;;  %v4420_v24 = vld [vmem:[%s5532_s5 + $0x70] sm:$0xff]  }
 0x17c   : > { %5559 = vst [vmem:[#allocation22_spill] sm:$0xff] %v5230_v36  ;;  %v1797_v41 = vpop.f32.mrf.mxu0  ;;  %v4421_v29 = vld [vmem:[%s5532_s5 + $0x30] sm:$0xff]   ;;  %3943 = vmatprep.subr.bf16.mxu1 %v4420_v24 }
 0x17d   : > { %5560 = vst [vmem:[#allocation23_spill] sm:$0xff] %v5232_v9  ;;  %v1990_v23 = vpop.f32.mrf.mxu1  ;;  %v1798_v26 = vadd.f32 %v1797_v41, %v4996_v31  ;;  %3944 = vmatpush3.bf16.msra.mxu1 %v4421_v29 }
 0x17e   : > { %v1799_v52 = vpop.f32.mrf.mxu0 }
 0x17f   : > { %v1992_v54 = vpop.f32.mrf.mxu1  ;;  %v5235_v8 = vadd.f32 %v1990_v23, %v1798_v26  ;;  %v1800_v56 = vadd.f32 %v1799_v52, %v5001_v33 }
 0x180   : > { %v1801_v21 = vpop.f32.mrf.mxu0 }
 0x181   : > { %5561 = vst [vmem:[#allocation24_spill] sm:$0xff] %v5235_v8  ;;  %v1994_v22 = vpop.f32.mrf.mxu1  ;;  %v5238_v49 = vadd.f32 %v1992_v54, %v1800_v56  ;;  %v1802_v13 = vadd.f32 %v1801_v21, %v4996_v31 }
 0x182   : > { %v5247_v41 = vpop.f32.mrf.mxu0 }
 0x183   : > { %5562 = vst [vmem:[#allocation25_spill] sm:$0xff] %v5238_v49  ;;  %5563 = vst [vmem:[#allocation26_spill] sm:$0xff] %v5247_v41  ;;  %v5249_v26 = vpop.f32.mrf.mxu1  ;;  %v5251_v23 = vadd.f32 %v1994_v22, %v1802_v13 }
 0x184   : > { %5564 = vst [vmem:[#allocation27_spill] sm:$0xff] %v5249_v26  ;;  %v1807_v52 = vpop.f32.mrf.mxu0 }
 0x185   : > { %5565 = vst [vmem:[#allocation28_spill] sm:$0xff] %v5251_v23  ;;  %v2000_v54 = vpop.f32.mrf.mxu1  ;;  %v1808_v56 = vadd.f32 %v1807_v52, %v4996_v31 }
 0x186   : > { %v1809_v21 = vpop.f32.mrf.mxu0 }
 0x187   : > { %v2002_v49 = vpop.f32.mrf.mxu1  ;;  %v5254_v8 = vadd.f32 %v2000_v54, %v1808_v56  ;;  %v1810_v9 = vadd.f32 %v1809_v21, %v5001_v33 }
 0x188   : > { %v1811_v36 = vpop.f32.mrf.mxu0 }
 0x189   : > { %5566 = vst [vmem:[#allocation29_spill] sm:$0xff] %v5254_v8  ;;  %v2004_v60 = vpop.f32.mrf.mxu1  ;;  %v5257_v12 = vadd.f32 %v2002_v49, %v1810_v9  ;;  %v1812_v26 = vadd.f32 %v1811_v36, %v4996_v31  ;;  %v4422_v31 = vld [vmem:[%s5532_s5 + $0x68] sm:$0xff]  }
 0x18a   : > { %v5260_v22 = vpop.f32.mrf.mxu0  ;;  %3945 = vmatprep.subr.bf16.mxu1 %v4422_v31 }
 0x18b   : > { %5567 = vst [vmem:[#allocation30_spill] sm:$0xff] %v5257_v12  ;;  %5568 = vst [vmem:[#allocation31_spill] sm:$0xff] %v5260_v22  ;;  %v5262_v13 = vpop.f32.mrf.mxu1  ;;  %v5264_v24 = vadd.f32 %v2004_v60, %v1812_v26  ;;  %v4423_v60 = vld [vmem:[%s5532_s5 + $0x28] sm:$0xff]  }
 0x18c   : > { %5569 = vst [vmem:[#allocation32_spill] sm:$0xff] %v5262_v13  ;;  %v2043_v29 = vpop.f32.mrf.mxu0  ;;  %3946 = vmatpush3.bf16.msra.mxu1 %v4423_v60 }
 0x18d   : > { %5570 = vst [vmem:[#allocation33_spill] sm:$0xff] %v5264_v24  ;;  %v2236_v52 = vpop.f32.mrf.mxu1  ;;  %v2044_v23 = vadd.f32 %v2043_v29, %v5006_v40 }
 0x18e   : > { %v2045_v54 = vpop.f32.mrf.mxu0 }
 0x18f   : > { %v2238_v56 = vpop.f32.mrf.mxu1  ;;  %v2046_v21 = vadd.f32 %v2045_v54, %v5011_v46  ;;  %v2237_v49 = vadd.f32 %v2236_v52, %v2044_v23 }
 0x190   : > { %v2047_v8 = vpop.f32.mrf.mxu0 }
 0x191   : > { %v2240_v41 = vpop.f32.mrf.mxu1  ;;  %v2048_v9 = vadd.f32 %v2047_v8, %v5021_v53  ;;  %v2239_v40 = vadd.f32 %v2238_v56, %v2046_v21  ;;  %v4424_v53 = vld [vmem:[%s5532_s5 + $0x60] sm:$0xff]   ;;  %v2395_v23 = vmax.f32 %v2237_v49, 0.0 }
 0x192   : > { %v2049_v36 = vpop.f32.mrf.mxu0  ;;  %v4425_v8 = vld [vmem:[%s5532_s5 + $0x20] sm:$0xff]   ;;  %3947 = vmatprep.subr.bf16.mxu1 %v4424_v53 }
 0x193   : > { %v2242_v26 = vpop.f32.mrf.mxu1  ;;  %v2241_v29 = vadd.f32 %v2240_v41, %v2048_v9  ;;  %v2050_v24 = vadd.f32 %v2049_v36, %v5025_v57  ;;  %v4426_v57 = vld [vmem:[%s5532_s5 + $0x58] sm:$0xff]   ;;  %v2396_v9 = vmax.f32 %v2239_v40, 0.0  ;;  %3948 = vmatpush3.bf16.msra.mxu1 %v4425_v8  ;;  %v4428_v40 = vld [vmem:[%s5532_s5 + $0x50] sm:$0xff]  }
 0x194   : > { %v2053_v46 = vpop.f32.mrf.mxu0  ;;  %3949 = vmatprep.subr.bf16.mxu1 %v4426_v57 }
 0x195   : > { %v2246_v54 = vpop.f32.mrf.mxu1  ;;  %v2397_v52 = vmax.f32 %v2241_v29, 0.0  ;;  %v2243_v13 = vadd.f32 %v2242_v26, %v2050_v24  ;;  %v2054_v56 = vadd.f32 %v2053_v46, %v5032_v62  ;;  %v4427_v24 = vld [vmem:[%s5532_s5 + $0x18] sm:$0xff]  }
 0x196   : > { %v2055_v41 = vpop.f32.mrf.mxu0 }
 0x197   : > { %v2248_v21 = vpop.f32.mrf.mxu1  ;;  %v2459_v31 = vpack.c.bf16 %v2397_v52, %v2395_v23  ;;  %v2398_v60 = vmax.f32 %v2243_v13, 0.0  ;;  %v2056_v36 = vadd.f32 %v2055_v41, %v5040_v5  ;;  %v2247_v62 = vadd.f32 %v2246_v54, %v2054_v56  ;;  %3950 = vmatpush3.bf16.msra.mxu1 %v4427_v24  ;;  %v4431_v24 = vld [vmem:[%s5532_s5 + $0x8] sm:$0xff]  }
 0x198   : > { %v2057_v12 = vpop.f32.mrf.mxu0  ;;  %3951 = vmatprep.subr.bf16.mxu1 %v4428_v40 }
 0x199   : > { %v2250_v22 = vpop.f32.mrf.mxu1  ;;  %v2058_v49 = vadd.f32 %v2057_v12, %v5044_v10  ;;  %v2460_v26 = vpack.c.bf16 %v2398_v60, %v2396_v9  ;;  %v2249_v46 = vadd.f32 %v2248_v21, %v2056_v36  ;;  %v4429_v10 = vld [vmem:[%s5532_s5 + $0x10] sm:$0xff]   ;;  %v2399_v12 = vmax.f32 %v2247_v62, 0.0 }
 0x19a   : > { %v2059_v29 = vpop.f32.mrf.mxu0 }
 0x19b   : > { %v2252_v13 = vpop.f32.mrf.mxu1  ;;  %v2251_v5 = vadd.f32 %v2250_v22, %v2058_v49  ;;  %v2060_v53 = vadd.f32 %v2059_v29, %v5048_v14  ;;  %2727 = vmatprep.mubr.bf16.mxu0 %v2460_v26  ;;  %v4430_v22 = vld [vmem:[%s5532_s5 + $0x48] sm:$0xff]   ;;  %v2400_v41 = vmax.f32 %v2249_v46, 0.0  ;;  %3952 = vmatpush3.bf16.msra.mxu1 %v4429_v10  ;;  %v4432_v26 = vld [vmem:[%s5532_s5 + $0x40] sm:$0xff]  }
 0x19c   : > { %v2063_v8 = vpop.f32.mrf.mxu0  ;;  %2728 = vmatmul.mubr.bf16.vlgmr.msra.gmra.mxu0 %v2459_v31  ;;  %3953 = vmatprep.subr.bf16.mxu1 %v4430_v22 }
 0x19d   : > { %v2256_v23 = vpop.f32.mrf.mxu1  ;;  %v2401_v54 = vmax.f32 %v2251_v5, 0.0  ;;  %v2253_v52 = vadd.f32 %v2252_v13, %v2060_v53  ;;  %v2064_v56 = vadd.f32 %v2063_v8, %v5052_v18 }
 0x19e   : > { %v2065_v14 = vpop.f32.mrf.mxu0 }
 0x19f   : > { %v2258_v57 = vpop.f32.mrf.mxu1  ;;  %v2461_v21 = vpack.c.bf16 %v2401_v54, %v2399_v12  ;;  %v2402_v9 = vmax.f32 %v2253_v52, 0.0  ;;  %v2066_v31 = vadd.f32 %v2065_v14, %v5057_v27  ;;  %v2257_v18 = vadd.f32 %v2256_v23, %v2064_v56  ;;  %3954 = vmatpush3.bf16.msra.mxu1 %v4431_v24 }
 0x1a0   : > { %v2067_v60 = vpop.f32.mrf.mxu0  ;;  %3955 = vmatprep.subr.bf16.mxu1 %v4432_v26 }
 0x1a1   : > { %v2260_v36 = vpop.f32.mrf.mxu1  ;;  %v2068_v62 = vadd.f32 %v2067_v60, %v5061_v34  ;;  %v2462_v49 = vpack.c.bf16 %v2402_v9, %v2400_v41  ;;  %v2259_v13 = vadd.f32 %v2258_v57, %v2066_v31  ;;  %v4433_v34 = vld [vmem:[%s5532_s5] sm:$0xff]   ;;  %v2403_v8 = vmax.f32 %v2257_v18, 0.0 }
 0x1a2   : > { %v2069_v40 = vpop.f32.mrf.mxu0 }
 0x1a3   : > { %v2262_v29 = vpop.f32.mrf.mxu1  ;;  %v2261_v27 = vadd.f32 %v2260_v36, %v2068_v62  ;;  %v2070_v46 = vadd.f32 %v2069_v40, %v5065_v39  ;;  %2737 = vmatprep.mubr.bf16.mxu0 %v2462_v49  ;;  %v2404_v56 = vmax.f32 %v2259_v13, 0.0  ;;  %3956 = vmatpush3.bf16.msra.mxu1 %v4433_v34  ;;  %v1704_v62 = vadd.f32 %v5095_v15, %v5001_v33 }
 0x1a4   : > { %v2073_v5 = vpop.f32.mrf.mxu0  ;;  %2738 = vmatmul.mubr.bf16.gmra.mxu0 %v2461_v21 }
 0x1a5   : > { %v2266_v53 = vpop.f32.mrf.mxu1  ;;  %v2405_v23 = vmax.f32 %v2261_v27, 0.0  ;;  %v2263_v10 = vadd.f32 %v2262_v29, %v2070_v46  ;;  %v2074_v12 = vadd.f32 %v2073_v5, %v5069_v44 }
 0x1a6   : > { %v2075_v54 = vpop.f32.mrf.mxu0 }
 0x1a7   : > { %v2268_v52 = vpop.f32.mrf.mxu1  ;;  %v2463_v22 = vpack.c.bf16 %v2405_v23, %v2403_v8  ;;  %v2406_v39 = vmax.f32 %v2263_v10, 0.0  ;;  %v2076_v14 = vadd.f32 %v2075_v54, %v5074_v51  ;;  %v2267_v21 = vadd.f32 %v2266_v53, %v2074_v12 }
 0x1a8   : > { %v2077_v57 = vpop.f32.mrf.mxu0  ;;  %v1897_v23 = vadd.f32 %v5097_v16, %v1704_v62 }
 0x1a9   : > { %v2270_v41 = vpop.f32.mrf.mxu1  ;;  %v2078_v9 = vadd.f32 %v2077_v57, %v5078_v58  ;;  %v2464_v31 = vpack.c.bf16 %v2406_v39, %v2404_v56  ;;  %v2269_v24 = vadd.f32 %v2268_v52, %v2076_v14  ;;  %v2407_v51 = vmax.f32 %v2267_v21, 0.0 }
 0x1aa   : > { %v2079_v60 = vpop.f32.mrf.mxu0  ;;  %v1714_v39 = vadd.f32 %v5113_v43, %v5001_v33 }
 0x1ab   : > { %v2272_v36 = vpop.f32.mrf.mxu1  ;;  %v2271_v18 = vadd.f32 %v2270_v41, %v2078_v9  ;;  %v2080_v44 = vadd.f32 %v2079_v60, %v5082_v63  ;;  %2747 = vmatprep.mubr.bf16.mxu0 %v2464_v31  ;;  %v2408_v46 = vmax.f32 %v2269_v24, 0.0 }
 0x1ac   : > { %v2083_v49 = vpop.f32.mrf.mxu0  ;;  %2748 = vmatmul.mubr.bf16.gmra.mxu0 %v2463_v22  ;;  %v1907_v62 = vadd.f32 %v5115_v45, %v1714_v39 }
 0x1ad   : > { %v2276_v26 = vpop.f32.mrf.mxu1  ;;  %v2409_v40 = vmax.f32 %v2271_v18, 0.0  ;;  %v2273_v29 = vadd.f32 %v2272_v36, %v2080_v44  ;;  %v2084_v13 = vadd.f32 %v2083_v49, %v5086_v3 }
 0x1ae   : > { %v2085_v58 = vpop.f32.mrf.mxu0 }
 0x1af   : > { %v2278_v27 = vpop.f32.mrf.mxu1  ;;  %v2465_v5 = vpack.c.bf16 %v2409_v40, %v2407_v51  ;;  %v2410_v53 = vmax.f32 %v2273_v29, 0.0  ;;  %v2086_v34 = vadd.f32 %v2085_v58, %v5091_v11  ;;  %v2277_v15 = vadd.f32 %v2276_v26, %v2084_v13 }
 0x1b0   : > { %v2087_v63 = vpop.f32.mrf.mxu0  ;;  %v1724_v58 = vadd.f32 %v5130_v4, %v5001_v33 }
 0x1b1   : > { %v2280_v8 = vpop.f32.mrf.mxu1  ;;  %v2088_v10 = vadd.f32 %v2087_v63, %v5099_v17  ;;  %v2466_v12 = vpack.c.bf16 %v2410_v53, %v2408_v46  ;;  %v2279_v56 = vadd.f32 %v2278_v27, %v2086_v34  ;;  %v2411_v11 = vmax.f32 %v2277_v15, 0.0 }
 0x1b2   : > { %v2089_v54 = vpop.f32.mrf.mxu0 }
 0x1b3   : > { %v2282_v52 = vpop.f32.mrf.mxu1  ;;  %v2281_v22 = vadd.f32 %v2280_v8, %v2088_v10  ;;  %v2090_v3 = vadd.f32 %v2089_v54, %v1897_v23  ;;  %2757 = vmatprep.mubr.bf16.mxu0 %v2466_v12  ;;  %v2412_v31 = vmax.f32 %v2279_v56, 0.0  ;;  %v1917_v54 = vadd.f32 %v5132_v6, %v1724_v58 }
 0x1b4   : > { %v2093_v14 = vpop.f32.mrf.mxu0  ;;  %2758 = vmatmul.mubr.bf16.gmra.mxu0 %v2465_v5 }
 0x1b5   : > { %v2286_v57 = vpop.f32.mrf.mxu1  ;;  %v2413_v41 = vmax.f32 %v2281_v22, 0.0  ;;  %v2283_v21 = vadd.f32 %v2282_v52, %v2090_v3  ;;  %v2094_v16 = vadd.f32 %v2093_v14, %v5104_v28 }
 0x1b6   : > { %v2095_v9 = vpop.f32.mrf.mxu0 }
 0x1b7   : > { %v2288_v17 = vpop.f32.mrf.mxu1  ;;  %v2467_v60 = vpack.c.bf16 %v2413_v41, %v2411_v11  ;;  %v2414_v36 = vmax.f32 %v2283_v21, 0.0  ;;  %v2096_v24 = vadd.f32 %v2095_v9, %v5109_v38  ;;  %v2287_v49 = vadd.f32 %v2286_v57, %v2094_v16 }
 0x1b8   : > { %v2097_v18 = vpop.f32.mrf.mxu0  ;;  %v1734_v57 = vadd.f32 %v5144_v30, %v5001_v33 }
 0x1b9   : > { %v2290_v44 = vpop.f32.mrf.mxu1  ;;  %v2468_v43 = vpack.c.bf16 %v2414_v36, %v2412_v31  ;;  %v2098_v26 = vadd.f32 %v2097_v18, %v5117_v47  ;;  %v2289_v29 = vadd.f32 %v2288_v17, %v2096_v24  ;;  %v2415_v38 = vmax.f32 %v2287_v49, 0.0 }
 0x1ba   : > { %v2099_v51 = vpop.f32.mrf.mxu0 }
 0x1bb   : > { %v2292_v40 = vpop.f32.mrf.mxu1  ;;  %v2291_v13 = vadd.f32 %v2290_v44, %v2098_v26  ;;  %v2100_v28 = vadd.f32 %v2099_v51, %v1907_v62  ;;  %2767 = vmatprep.mubr.bf16.mxu0 %v2468_v43  ;;  %v2416_v47 = vmax.f32 %v2289_v29, 0.0  ;;  %v1927_v44 = vadd.f32 %v5146_v32, %v1734_v57 }
 0x1bc   : > { %v2103_v27 = vpop.f32.mrf.mxu0  ;;  %2768 = vmatmul.mubr.bf16.gmra.mxu0 %v2467_v60  ;;  %v1744_v29 = vadd.f32 %v5157_v61, %v5001_v33 }
 0x1bd   : > { %v2296_v46 = vpop.f32.mrf.mxu1  ;;  %v2417_v5 = vmax.f32 %v2291_v13, 0.0  ;;  %v2293_v53 = vadd.f32 %v2292_v40, %v2100_v28  ;;  %v2104_v45 = vadd.f32 %v2103_v27, %v5122_v55 }
 0x1be   : > { %v2105_v34 = vpop.f32.mrf.mxu0 }
 0x1bf   : > { %v2298_v63 = vpop.f32.mrf.mxu1  ;;  %v2469_v8 = vpack.c.bf16 %v2417_v5, %v2415_v38  ;;  %v2418_v23 = vmax.f32 %v2293_v53, 0.0  ;;  %v2106_v15 = vadd.f32 %v2105_v34, %v5127_v1  ;;  %v2297_v52 = vadd.f32 %v2296_v46, %v2104_v45 }
 0x1c0   : > { %v2107_v10 = vpop.f32.mrf.mxu0 }
 0x1c1   : > { %v2300_v12 = vpop.f32.mrf.mxu1  ;;  %v2470_v4 = vpack.c.bf16 %v2418_v23, %v2416_v47  ;;  %v2108_v56 = vadd.f32 %v2107_v10, %v5134_v7  ;;  %v2299_v39 = vadd.f32 %v2298_v63, %v2106_v15  ;;  %v2419_v1 = vmax.f32 %v2297_v52, 0.0 }
 0x1c2   : > { %v2109_v22 = vpop.f32.mrf.mxu0  ;;  %v1937_v47 = vadd.f32 %v5159_v0, %v1744_v29  ;;  %v5574_v29 = vld [vmem:[#allocation5_spill] sm:$0xff] }
 0x1c3   : > { %v2302_v3 = vpop.f32.mrf.mxu1  ;;  %v2301_v14 = vadd.f32 %v2300_v12, %v2108_v56  ;;  %v2110_v55 = vadd.f32 %v2109_v22, %v1917_v54  ;;  %2777 = vmatprep.mubr.bf16.mxu0 %v2470_v4  ;;  %v2420_v7 = vmax.f32 %v2299_v39, 0.0  ;;  %v1754_v4 = vadd.f32 %v5170_v42, %v5001_v33 }
 0x1c4   : > { %v2113_v11 = vpop.f32.mrf.mxu0  ;;  %2778 = vmatmul.mubr.bf16.gmra.mxu0 %v2469_v8 }
 0x1c5   : > { %v2306_v41 = vpop.f32.mrf.mxu1  ;;  %v2421_v21 = vmax.f32 %v2301_v14, 0.0  ;;  %v2303_v16 = vadd.f32 %v2302_v3, %v2110_v55  ;;  %v2114_v6 = vadd.f32 %v2113_v11, %v5138_v19 }
 0x1c6   : > { %v2115_v9 = vpop.f32.mrf.mxu0 }
 0x1c7   : > { %v2308_v17 = vpop.f32.mrf.mxu1  ;;  %v2471_v31 = vpack.c.bf16 %v2421_v21, %v2419_v1  ;;  %v2422_v60 = vmax.f32 %v2303_v16, 0.0  ;;  %v2116_v36 = vadd.f32 %v2115_v9, %v5141_v25  ;;  %v2307_v62 = vadd.f32 %v2306_v41, %v2114_v6  ;;  %v5571_v6 = vld [vmem:[#allocation3_spill] sm:$0xff] }
 0x1c8   : > { %v2117_v24 = vpop.f32.mrf.mxu0  ;;  %v1947_v21 = vadd.f32 %v5172_v48, %v1754_v4  ;;  %v5573_v48 = vld [vmem:[#allocation4_spill] sm:$0xff] }
 0x1c9   : > { %v2310_v18 = vpop.f32.mrf.mxu1  ;;  %v2472_v30 = vpack.c.bf16 %v2422_v60, %v2420_v7  ;;  %v2118_v43 = vadd.f32 %v2117_v24, %v5148_v35  ;;  %v2309_v51 = vadd.f32 %v2308_v17, %v2116_v36  ;;  %v2423_v25 = vmax.f32 %v2307_v62, 0.0  ;;  %v5572_v36 = vld [vmem:[#allocation6_spill] sm:$0xff] }
 0x1ca   : > { %v2119_v49 = vpop.f32.mrf.mxu0  ;;  %v1764_v24 = vadd.f32 %v5572_v36, %v5001_v33 }
 0x1cb   : > { %v2312_v26 = vpop.f32.mrf.mxu1  ;;  %v2311_v40 = vadd.f32 %v2310_v18, %v2118_v43  ;;  %v2120_v19 = vadd.f32 %v2119_v49, %v1927_v44  ;;  %2787 = vmatprep.mubr.bf16.mxu0 %v2472_v30  ;;  %v2424_v35 = vmax.f32 %v2309_v51, 0.0 }
 0x1cc   : > { %v2123_v13 = vpop.f32.mrf.mxu0  ;;  %2788 = vmatmul.mubr.bf16.gmra.mxu0 %v2471_v31 }
 0x1cd   : > { %v2316_v28 = vpop.f32.mrf.mxu1  ;;  %v2425_v58 = vmax.f32 %v2311_v40, 0.0  ;;  %v2313_v27 = vadd.f32 %v2312_v26, %v2120_v19  ;;  %v2124_v32 = vadd.f32 %v2123_v13, %v5151_v50 }
 0x1ce   : > { %v2125_v46 = vpop.f32.mrf.mxu0 }
 0x1cf   : > { %v2318_v38 = vpop.f32.mrf.mxu1  ;;  %v2473_v5 = vpack.c.bf16 %v2425_v58, %v2423_v25  ;;  %v2426_v53 = vmax.f32 %v2313_v27, 0.0  ;;  %v2126_v45 = vadd.f32 %v2125_v46, %v5154_v59  ;;  %v2317_v8 = vadd.f32 %v2316_v28, %v2124_v32  ;;  %v5575_v58 = vld [vmem:[#allocation7_spill] sm:$0xff] }
 0x1d0   : > { %v2127_v34 = vpop.f32.mrf.mxu0  ;;  %v1957_v27 = vadd.f32 %v5575_v58, %v1764_v24 }
 0x1d1   : > { %v2320_v63 = vpop.f32.mrf.mxu1  ;;  %v2474_v61 = vpack.c.bf16 %v2426_v53, %v2424_v35  ;;  %v2128_v23 = vadd.f32 %v2127_v34, %v5161_v2  ;;  %v2319_v12 = vadd.f32 %v2318_v38, %v2126_v45  ;;  %v2427_v59 = vmax.f32 %v2317_v8, 0.0  ;;  %v5576_v38 = vld [vmem:[#allocation8_spill] sm:$0xff] }
 0x1d2   : > { %v2129_v15 = vpop.f32.mrf.mxu0 }
 0x1d3   : > { %v2322_v10 = vpop.f32.mrf.mxu1  ;;  %v2321_v54 = vadd.f32 %v2320_v63, %v2128_v23  ;;  %v2130_v50 = vadd.f32 %v2129_v15, %v1937_v47  ;;  %2797 = vmatprep.mubr.bf16.mxu0 %v2474_v61  ;;  %v2428_v2 = vmax.f32 %v2319_v12, 0.0  ;;  %v5577_v47 = vld [vmem:[#allocation11_spill] sm:$0xff] }
 0x1d4   : > { %v2133_v52 = vpop.f32.mrf.mxu0  ;;  %2798 = vmatmul.mubr.bf16.gmra.mxu0 %v2473_v5  ;;  %v1774_v61 = vadd.f32 %v5577_v47, %v5001_v33 }
 0x1d5   : > { %v2326_v56 = vpop.f32.mrf.mxu1  ;;  %v2429_v22 = vmax.f32 %v2321_v54, 0.0  ;;  %v2323_v3 = vadd.f32 %v2322_v10, %v2130_v50  ;;  %v2134_v0 = vadd.f32 %v2133_v52, %v5164_v20  ;;  %v5578_v54 = vld [vmem:[#allocation9_spill] sm:$0xff] }
 0x1d6   : > { %v2135_v39 = vpop.f32.mrf.mxu0 }
 0x1d7   : > { %v2328_v14 = vpop.f32.mrf.mxu1  ;;  %v2475_v55 = vpack.c.bf16 %v2429_v22, %v2427_v59  ;;  %v2430_v57 = vmax.f32 %v2323_v3, 0.0  ;;  %v2136_v11 = vadd.f32 %v2135_v39, %v5167_v37  ;;  %v2327_v16 = vadd.f32 %v2326_v56, %v2134_v0  ;;  %v5579_v3 = vld [vmem:[#allocation10_spill] sm:$0xff] }
 0x1d8   : > { %v2137_v41 = vpop.f32.mrf.mxu0 }
 0x1d9   : > { %v2330_v1 = vpop.f32.mrf.mxu1  ;;  %v2476_v42 = vpack.c.bf16 %v2430_v57, %v2428_v2  ;;  %v2138_v9 = vadd.f32 %v2137_v41, %v5571_v6  ;;  %v2329_v31 = vadd.f32 %v2328_v14, %v2136_v11  ;;  %v2431_v37 = vmax.f32 %v2327_v16, 0.0  ;;  %v5580_v2 = vld [vmem:[#allocation12_spill] sm:$0xff]  ;;  %v5581_v41 = vld [vmem:[#allocation13_spill] sm:$0xff] }
 0x1da   : > { %v2139_v17 = vpop.f32.mrf.mxu0 }
 0x1db   : > { %v2332_v7 = vpop.f32.mrf.mxu1  ;;  %v2331_v60 = vadd.f32 %v2330_v1, %v2138_v9  ;;  %v2140_v20 = vadd.f32 %v2139_v17, %v1947_v21  ;;  %2807 = vmatprep.mubr.bf16.mxu0 %v2476_v42  ;;  %v2432_v51 = vmax.f32 %v2329_v31, 0.0  ;;  %v5582_v17 = vld [vmem:[#allocation16_spill] sm:$0xff] }
 0x1dc   : > { %v2143_v18 = vpop.f32.mrf.mxu0  ;;  %2808 = vmatmul.mubr.bf16.gmra.mxu0 %v2475_v55  ;;  %v1967_v55 = vadd.f32 %v5580_v2, %v1774_v61 }
 0x1dd   : > { %v2336_v44 = vpop.f32.mrf.mxu1  ;;  %v2433_v30 = vmax.f32 %v2331_v60, 0.0  ;;  %v2333_v62 = vadd.f32 %v2332_v7, %v2140_v20  ;;  %v2144_v43 = vadd.f32 %v2143_v18, %v5573_v48  ;;  %v1784_v7 = vadd.f32 %v5582_v17, %v5001_v33  ;;  %v5583_v18 = vld [vmem:[#allocation14_spill] sm:$0xff] }
 0x1de   : > { %v2145_v49 = vpop.f32.mrf.mxu0 }
 0x1df   : > { %v2338_v26 = vpop.f32.mrf.mxu1  ;;  %v2477_v40 = vpack.c.bf16 %v2433_v30, %v2431_v37  ;;  %v2434_v19 = vmax.f32 %v2333_v62, 0.0  ;;  %v2146_v13 = vadd.f32 %v2145_v49, %v5574_v29  ;;  %v2337_v46 = vadd.f32 %v2336_v44, %v2144_v43  ;;  %v5584_v49 = vld [vmem:[#allocation15_spill] sm:$0xff] }
 0x1e0   : > { %v2147_v28 = vpop.f32.mrf.mxu0 }
 0x1e1   : > { %v2340_v25 = vpop.f32.mrf.mxu1  ;;  %v2478_v32 = vpack.c.bf16 %v2434_v19, %v2432_v51  ;;  %v2148_v35 = vadd.f32 %v2147_v28, %v5576_v38  ;;  %v2339_v45 = vadd.f32 %v2338_v26, %v2146_v13  ;;  %v2435_v15 = vmax.f32 %v2337_v46, 0.0  ;;  %v5585_v19 = vld [vmem:[#allocation17_spill] sm:$0xff] }
 0x1e2   : > { %v2149_v5 = vpop.f32.mrf.mxu0  ;;  %v1977_v29 = vadd.f32 %v5585_v19, %v1784_v7 }
 0x1e3   : > { %v2342_v53 = vpop.f32.mrf.mxu1  ;;  %v2341_v34 = vadd.f32 %v2340_v25, %v2148_v35  ;;  %v2150_v63 = vadd.f32 %v2149_v5, %v1957_v27  ;;  %2817 = vmatprep.mubr.bf16.mxu0 %v2478_v32  ;;  %v2436_v56 = vmax.f32 %v2339_v45, 0.0  ;;  %v5586_v25 = vld [vmem:[#allocation18_spill] sm:$0xff]  ;;  %v5587_v5 = vld [vmem:[#allocation21_spill] sm:$0xff] }
 0x1e4   : > { %v2153_v8 = vpop.f32.mrf.mxu0  ;;  %2818 = vmatmul.mubr.bf16.gmra.mxu0 %v2477_v40 }
 0x1e5   : > { %v2346_v23 = vpop.f32.mrf.mxu1  ;;  %v2437_v10 = vmax.f32 %v2341_v34, 0.0  ;;  %v2343_v12 = vadd.f32 %v2342_v53, %v2150_v63  ;;  %v2154_v50 = vadd.f32 %v2153_v8, %v5578_v54  ;;  %v1794_v53 = vadd.f32 %v5587_v5, %v5001_v33  ;;  %v5588_v8 = vld [vmem:[#allocation19_spill] sm:$0xff] }
 0x1e6   : > { %v2155_v4 = vpop.f32.mrf.mxu0 }
 0x1e7   : > { %v2348_v52 = vpop.f32.mrf.mxu1  ;;  %v2479_v59 = vpack.c.bf16 %v2437_v10, %v2435_v15  ;;  %v2438_v22 = vmax.f32 %v2343_v12, 0.0  ;;  %v2156_v0 = vadd.f32 %v2155_v4, %v5579_v3  ;;  %v2347_v11 = vadd.f32 %v2346_v23, %v2154_v50  ;;  %v5589_v4 = vld [vmem:[#allocation20_spill] sm:$0xff] }
 0x1e8   : > { %v2157_v39 = vpop.f32.mrf.mxu0 }
 0x1e9   : > { %v2350_v14 = vpop.f32.mrf.mxu1  ;;  %v2480_v57 = vpack.c.bf16 %v2438_v22, %v2436_v56  ;;  %v2158_v1 = vadd.f32 %v2157_v39, %v5581_v41  ;;  %v2349_v16 = vadd.f32 %v2348_v52, %v2156_v0  ;;  %v2439_v20 = vmax.f32 %v2347_v11, 0.0  ;;  %v5590_v22 = vld [vmem:[#allocation22_spill] sm:$0xff] }
 0x1ea   : > { %v2159_v21 = vpop.f32.mrf.mxu0  ;;  %v1987_v3 = vadd.f32 %v5590_v22, %v1794_v53 }
 0x1eb   : > { %v2352_v42 = vpop.f32.mrf.mxu1  ;;  %v2351_v6 = vadd.f32 %v2350_v14, %v2158_v1  ;;  %v2160_v9 = vadd.f32 %v2159_v21, %v1967_v55  ;;  %2827 = vmatprep.mubr.bf16.mxu0 %v2480_v57  ;;  %v2440_v62 = vmax.f32 %v2349_v16, 0.0  ;;  %v5591_v14 = vld [vmem:[#allocation23_spill] sm:$0xff]  ;;  %v5592_v21 = vld [vmem:[#allocation26_spill] sm:$0xff] }
 0x1ec   : > { %v2163_v31 = vpop.f32.mrf.mxu0  ;;  %2828 = vmatmul.mubr.bf16.gmra.mxu0 %v2479_v59 }
 0x1ed   : > { %v2356_v60 = vpop.f32.mrf.mxu1  ;;  %v2441_v36 = vmax.f32 %v2351_v6, 0.0  ;;  %v2353_v24 = vadd.f32 %v2352_v42, %v2160_v9  ;;  %v2164_v44 = vadd.f32 %v2163_v31, %v5583_v18  ;;  %v1804_v42 = vadd.f32 %v5592_v21, %v5001_v33  ;;  %v5593_v31 = vld [vmem:[#allocation24_spill] sm:$0xff] }
 0x1ee   : > { %v2165_v37 = vpop.f32.mrf.mxu0 }
 0x1ef   : > { %v2358_v30 = vpop.f32.mrf.mxu1  ;;  %v2481_v48 = vpack.c.bf16 %v2441_v36, %v2439_v20  ;;  %v2442_v43 = vmax.f32 %v2353_v24, 0.0  ;;  %v2166_v26 = vadd.f32 %v2165_v37, %v5584_v49  ;;  %v2357_v28 = vadd.f32 %v2356_v60, %v2164_v44  ;;  %v5594_v37 = vld [vmem:[#allocation25_spill] sm:$0xff] }
 0x1f0   : > { %v2167_v51 = vpop.f32.mrf.mxu0 }
 0x1f1   : > { %v2360_v40 = vpop.f32.mrf.mxu1  ;;  %v2482_v13 = vpack.c.bf16 %v2442_v43, %v2440_v62  ;;  %v2168_v58 = vadd.f32 %v2167_v51, %v5586_v25  ;;  %v2359_v46 = vadd.f32 %v2358_v30, %v2166_v26  ;;  %v2443_v63 = vmax.f32 %v2357_v28, 0.0  ;;  %v5595_v43 = vld [vmem:[#allocation27_spill] sm:$0xff] }
 0x1f2   : > { %v2169_v27 = vpop.f32.mrf.mxu0  ;;  %v1997_v49 = vadd.f32 %v5595_v43, %v1804_v42  ;;  %v2523_v42 = vld [vmem:[%s5531_s4] sm:$0x3] }
 0x1f3   : > { %v2362_v32 = vpop.f32.mrf.mxu1  ;;  %v2361_v38 = vadd.f32 %v2360_v40, %v2168_v58  ;;  %v2170_v35 = vadd.f32 %v2169_v27, %v1977_v29  ;;  %2837 = vmatprep.mubr.bf16.mxu0 %v2482_v13  ;;  %v2444_v12 = vmax.f32 %v2359_v46, 0.0  ;;  %v5596_v40 = vld [vmem:[#allocation28_spill] sm:$0xff]  ;;  %v5597_v27 = vld [vmem:[#allocation31_spill] sm:$0xff] }
 0x1f4   : > { %v2173_v45 = vpop.f32.mrf.mxu0  ;;  %2838 = vmatmul.mubr.bf16.gmra.mxu0 %v2481_v48 }
 0x1f5   : > { %v2366_v34 = vpop.f32.mrf.mxu1  ;;  %v2445_v47 = vmax.f32 %v2361_v38, 0.0  ;;  %v2363_v61 = vadd.f32 %v2362_v32, %v2170_v35  ;;  %v2174_v23 = vadd.f32 %v2173_v45, %v5588_v8  ;;  %v1814_v32 = vadd.f32 %v5597_v27, %v5001_v33  ;;  %v5598_v45 = vld [vmem:[#allocation29_spill] sm:$0xff] }
 0x1f6   : > { %v2175_v15 = vpop.f32.mrf.mxu0 }
 0x1f7   : > { %v2368_v10 = vpop.f32.mrf.mxu1  ;;  %v2483_v54 = vpack.c.bf16 %v2445_v47, %v2443_v63  ;;  %v2446_v50 = vmax.f32 %v2363_v61, 0.0  ;;  %v2176_v52 = vadd.f32 %v2175_v15, %v5589_v4  ;;  %v2367_v39 = vadd.f32 %v2366_v34, %v2174_v23  ;;  %v5599_v15 = vld [vmem:[#allocation30_spill] sm:$0xff] }
 0x1f8   : > { %v2177_v56 = vpop.f32.mrf.mxu0 }
 0x1f9   : > { %v2370_v59 = vpop.f32.mrf.mxu1  ;;  %v2484_v0 = vpack.c.bf16 %v2446_v50, %v2444_v12  ;;  %v2178_v2 = vadd.f32 %v2177_v56, %v5591_v14  ;;  %v2369_v11 = vadd.f32 %v2368_v10, %v2176_v52  ;;  %v2447_v9 = vmax.f32 %v2367_v39, 0.0  ;;  %v5600_v50 = vld [vmem:[#allocation32_spill] sm:$0xff]  ;;  %v5601_v56 = vld [vmem:[#allocation33_spill] sm:$0xff] }
 0x1fa   : > { %v2179_v55 = vpop.f32.mrf.mxu0  ;;  %v2007_v4 = vadd.f32 %v5600_v50, %v1814_v32 }
 0x1fb   : > { %v2372_v57 = vpop.f32.mrf.mxu1  ;;  %v2371_v41 = vadd.f32 %v2370_v59, %v2178_v2  ;;  %v2180_v1 = vadd.f32 %v2179_v55, %v1987_v3  ;;  %2847 = vmatprep.mubr.bf16.mxu0 %v2484_v0  ;;  %v2448_v24 = vmax.f32 %v2369_v11, 0.0 }
 0x1fc   : > { %v2183_v16 = vpop.f32.mrf.mxu0  ;;  %2848 = vmatmul.mubr.bf16.gmra.mxu0 %v2483_v54 }
 0x1fd   : > { %v2376_v6 = vpop.f32.mrf.mxu1  ;;  %v2449_v17 = vmax.f32 %v2371_v41, 0.0  ;;  %v2373_v7 = vadd.f32 %v2372_v57, %v2180_v1  ;;  %v2184_v60 = vadd.f32 %v2183_v16, %v5593_v31 }
 0x1fe   : > { %v2185_v20 = vpop.f32.mrf.mxu0 }
 0x1ff   : > { %v2378_v36 = vpop.f32.mrf.mxu1  ;;  %v2485_v18 = vpack.c.bf16 %v2449_v17, %v2447_v9  ;;  %v2450_v44 = vmax.f32 %v2373_v7, 0.0  ;;  %v2186_v30 = vadd.f32 %v2185_v20, %v5594_v37  ;;  %v2377_v51 = vadd.f32 %v2376_v6, %v2184_v60  ;;  %v5602_v6 = vld [vmem:[#allocation2_spill] sm:$0xff] }
 0x200   : > { %v2187_v62 = vpop.f32.mrf.mxu0  ;;  %v5603_v9 = vsub.s32 1, %v5602_v6  ;;  %v5604_v7 = vsub.s32 0, %v5602_v6 }
 0x201   : > { %v2380_v48 = vpop.f32.mrf.mxu1  ;;  %v2486_v26 = vpack.c.bf16 %v2450_v44, %v2448_v24  ;;  %v2188_v19 = vadd.f32 %v2187_v62, %v5596_v40  ;;  %v2379_v28 = vadd.f32 %v2378_v36, %v2186_v30  ;;  %v2451_v35 = vmax.f32 %v2377_v51, 0.0 }
 0x202   : > { %v2189_v29 = vpop.f32.mrf.mxu0  ;;  %v5395_v17 = vrot.slane %v2523_v42, %v5603_v9  ;;  %v5399_v31 = vrot.slane %v2523_v42, %v5604_v7 }
 0x203   : > { %v2382_v13 = vpop.f32.mrf.mxu1  ;;  %v2381_v25 = vadd.f32 %v2380_v48, %v2188_v19  ;;  %v2190_v58 = vadd.f32 %v2189_v29, %v1997_v49  ;;  %2857 = vmatprep.mubr.bf16.mxu0 %v2486_v26  ;;  %v2452_v61 = vmax.f32 %v2379_v28, 0.0 }
 0x204   : > { %v2193_v46 = vpop.f32.mrf.mxu0  ;;  %2858 = vmatmul.mubr.bf16.gmra.mxu0 %v2485_v18 }
 0x205   : > { %v2386_v38 = vpop.f32.mrf.mxu1  ;;  %v2453_v5 = vmax.f32 %v2381_v25, 0.0  ;;  %v2383_v53 = vadd.f32 %v2382_v13, %v2190_v58  ;;  %v2194_v34 = vadd.f32 %v2193_v46, %v5598_v45 }
 0x206   : > { %v2195_v63 = vpop.f32.mrf.mxu0 }
 0x207   : > { %v2388_v47 = vpop.f32.mrf.mxu1  ;;  %v2487_v8 = vpack.c.bf16 %v2453_v5, %v2451_v35  ;;  %v2454_v23 = vmax.f32 %v2383_v53, 0.0  ;;  %v2196_v10 = vadd.f32 %v2195_v63, %v5599_v15  ;;  %v2387_v52 = vadd.f32 %v2386_v38, %v2194_v34 }
 0x208   : > { %v2197_v12 = vpop.f32.mrf.mxu0 }
 0x209   : > { %v2390_v54 = vpop.f32.mrf.mxu1  ;;  %v2488_v33 = vpack.c.bf16 %v2454_v23, %v2452_v61  ;;  %v2198_v59 = vadd.f32 %v2197_v12, %v5601_v56  ;;  %v2389_v3 = vadd.f32 %v2388_v47, %v2196_v10  ;;  %v2455_v2 = vmax.f32 %v2387_v52, 0.0 }
 0x20a   : > { %v2199_v22 = vpop.f32.mrf.mxu0 }
 0x20b   : > { %v2391_v0 = vadd.f32 %v2390_v54, %v2198_v59  ;;  %v2200_v39 = vadd.f32 %v2199_v22, %v2007_v4  ;;  %2867 = vmatprep.mubr.bf16.mxu0 %v2488_v33  ;;  %v2392_v14 = vpop.f32.mrf.mxu1  ;;  %v2456_v11 = vmax.f32 %v2389_v3, 0.0 }
 0x20c   : > { %2868 = vmatmul.mubr.bf16.gmra.mxu0 %v2487_v8 }
 0x20d   : > { %v2457_v55 = vmax.f32 %v2391_v0, 0.0  ;;  %v2393_v57 = vadd.f32 %v2392_v14, %v2200_v39 }
 0x20f   : > { %v2489_v41 = vpack.c.bf16 %v2457_v55, %v2455_v2  ;;  %v2458_v1 = vmax.f32 %v2393_v57, 0.0 }
 0x211   : > { %v2490_v21 = vpack.c.bf16 %v2458_v1, %v2456_v11 }
 0x213   : > { %2877 = vmatprep.mubr.bf16.mxu0 %v2490_v21 }
 0x214   : > { %2878 = vmatmul.mubr.bf16.gmra.mxu0 %v2489_v41 }
 0x25c   : > { %v2729_v16 = vpop.f32.mrf.mxu0 }
 0x25d   : > { %v2730_v18 = vadd.f32 %v2729_v16, %v5399_v31 }
 0x25e   : > { %v2731_v60 = vpop.f32.mrf.mxu0 }
 0x25f   : > { %v2732_v36 = vadd.f32 %v2731_v60, %v5395_v17  ;;  %v2888_v49 = vmax.f32 %v2730_v18, 0.0 }
 0x260   : > { %v2733_v20 = vpop.f32.mrf.mxu0 }
 0x261   : > { %v2734_v24 = vadd.f32 %v2733_v20, %v5399_v31  ;;  %v2889_v48 = vmax.f32 %v2732_v36, 0.0 }
 0x262   : > { %v2735_v44 = vpop.f32.mrf.mxu0 }
 0x263   : > { %v2736_v37 = vadd.f32 %v2735_v44, %v5395_v17  ;;  %v2890_v30 = vmax.f32 %v2734_v24, 0.0 }
 0x264   : > { %v2739_v62 = vpop.f32.mrf.mxu0 }
 0x265   : > { %v2891_v43 = vmax.f32 %v2736_v37, 0.0  ;;  %v2952_v40 = vpack.c.bf16 %v2890_v30, %v2888_v49  ;;  %v2740_v28 = vadd.f32 %v2739_v62, %v5399_v31 }
 0x266   : > { %v2741_v26 = vpop.f32.mrf.mxu0 }
 0x267   : > { %v2953_v51 = vpack.c.bf16 %v2891_v43, %v2889_v48  ;;  %v2742_v29 = vadd.f32 %v2741_v26, %v5395_v17  ;;  %v2892_v35 = vmax.f32 %v2740_v28, 0.0 }
 0x268   : > { %v2743_v19 = vpop.f32.mrf.mxu0 }
 0x269   : > { %v2744_v13 = vadd.f32 %v2743_v19, %v5399_v31  ;;  %3151 = vmatprep.mubr.bf16.mxu1 %v2953_v51  ;;  %v2893_v46 = vmax.f32 %v2742_v29, 0.0 }
 0x26a   : > { %v2745_v25 = vpop.f32.mrf.mxu0  ;;  %3152 = vmatmul.mubr.bf16.vlgmr.msra.gmra.mxu1 %v2952_v40 }
 0x26b   : > { %v2746_v58 = vadd.f32 %v2745_v25, %v5395_v17  ;;  %v2894_v27 = vmax.f32 %v2744_v13, 0.0 }
 0x26c   : > { %v2749_v32 = vpop.f32.mrf.mxu0 }
 0x26d   : > { %v2895_v38 = vmax.f32 %v2746_v58, 0.0  ;;  %v2954_v45 = vpack.c.bf16 %v2894_v27, %v2892_v35  ;;  %v2750_v61 = vadd.f32 %v2749_v32, %v5399_v31 }
 0x26e   : > { %v2751_v5 = vpop.f32.mrf.mxu0 }
 0x26f   : > { %v2955_v53 = vpack.c.bf16 %v2895_v38, %v2893_v46  ;;  %v2752_v63 = vadd.f32 %v2751_v5, %v5395_v17  ;;  %v2896_v50 = vmax.f32 %v2750_v61, 0.0 }
 0x270   : > { %v2753_v34 = vpop.f32.mrf.mxu0 }
 0x271   : > { %v2754_v47 = vadd.f32 %v2753_v34, %v5399_v31  ;;  %3159 = vmatprep.mubr.bf16.mxu1 %v2955_v53  ;;  %v2897_v12 = vmax.f32 %v2752_v63, 0.0 }
 0x272   : > { %v2755_v8 = vpop.f32.mrf.mxu0  ;;  %3160 = vmatmul.mubr.bf16.gmra.mxu1 %v2954_v45 }
 0x273   : > { %v2756_v23 = vadd.f32 %v2755_v8, %v5395_v17  ;;  %v2898_v15 = vmax.f32 %v2754_v47, 0.0 }
 0x274   : > { %v2759_v10 = vpop.f32.mrf.mxu0 }
 0x275   : > { %v2899_v54 = vmax.f32 %v2756_v23, 0.0  ;;  %v2956_v52 = vpack.c.bf16 %v2898_v15, %v2896_v50  ;;  %v2760_v3 = vadd.f32 %v2759_v10, %v5399_v31 }
 0x276   : > { %v2761_v4 = vpop.f32.mrf.mxu0 }
 0x277   : > { %v2957_v33 = vpack.c.bf16 %v2899_v54, %v2897_v12  ;;  %v2762_v59 = vadd.f32 %v2761_v4, %v5395_v17  ;;  %v2900_v11 = vmax.f32 %v2760_v3, 0.0 }
 0x278   : > { %v2763_v56 = vpop.f32.mrf.mxu0 }
 0x279   : > { %v2764_v22 = vadd.f32 %v2763_v56, %v5399_v31  ;;  %3167 = vmatprep.mubr.bf16.mxu1 %v2957_v33  ;;  %v2901_v55 = vmax.f32 %v2762_v59, 0.0 }
 0x27a   : > { %v2765_v0 = vpop.f32.mrf.mxu0  ;;  %3168 = vmatmul.mubr.bf16.gmra.mxu1 %v2956_v52 }
 0x27b   : > { %v2766_v39 = vadd.f32 %v2765_v0, %v5395_v17  ;;  %v2902_v14 = vmax.f32 %v2764_v22, 0.0 }
 0x27c   : > { %v2769_v2 = vpop.f32.mrf.mxu0 }
 0x27d   : > { %v2903_v57 = vmax.f32 %v2766_v39, 0.0  ;;  %v2958_v21 = vpack.c.bf16 %v2902_v14, %v2900_v11  ;;  %v2770_v9 = vadd.f32 %v2769_v2, %v5399_v31 }
 0x27e   : > { %v2771_v41 = vpop.f32.mrf.mxu0 }
 0x27f   : > { %v2959_v1 = vpack.c.bf16 %v2903_v57, %v2901_v55  ;;  %v2772_v16 = vadd.f32 %v2771_v41, %v5395_v17  ;;  %v2904_v44 = vmax.f32 %v2770_v9, 0.0 }
 0x280   : > { %v2773_v42 = vpop.f32.mrf.mxu0 }
 0x281   : > { %v2774_v6 = vadd.f32 %v2773_v42, %v5399_v31  ;;  %3175 = vmatprep.mubr.bf16.mxu1 %v2959_v1  ;;  %v2905_v24 = vmax.f32 %v2772_v16, 0.0 }
 0x282   : > { %v2775_v7 = vpop.f32.mrf.mxu0  ;;  %3176 = vmatmul.mubr.bf16.gmra.mxu1 %v2958_v21 }
 0x283   : > { %v2776_v60 = vadd.f32 %v2775_v7, %v5395_v17  ;;  %v2906_v20 = vmax.f32 %v2774_v6, 0.0 }
 0x284   : > { %v2779_v36 = vpop.f32.mrf.mxu0 }
 0x285   : > { %v2907_v18 = vmax.f32 %v2776_v60, 0.0  ;;  %v2960_v62 = vpack.c.bf16 %v2906_v20, %v2904_v44  ;;  %v2780_v26 = vadd.f32 %v2779_v36, %v5399_v31 }
 0x286   : > { %v2781_v37 = vpop.f32.mrf.mxu0 }
 0x287   : > { %v2961_v30 = vpack.c.bf16 %v2907_v18, %v2905_v24  ;;  %v2782_v43 = vadd.f32 %v2781_v37, %v5395_v17  ;;  %v2908_v25 = vmax.f32 %v2780_v26, 0.0 }
 0x288   : > { %v2783_v48 = vpop.f32.mrf.mxu0 }
 0x289   : > { %v2784_v49 = vadd.f32 %v2783_v48, %v5399_v31  ;;  %3183 = vmatprep.mubr.bf16.mxu1 %v2961_v30  ;;  %v2909_v13 = vmax.f32 %v2782_v43, 0.0 }
 0x28a   : > { %v2785_v51 = vpop.f32.mrf.mxu0  ;;  %3184 = vmatmul.mubr.bf16.gmra.mxu1 %v2960_v62 }
 0x28b   : > { %v2786_v40 = vadd.f32 %v2785_v51, %v5395_v17  ;;  %v2910_v19 = vmax.f32 %v2784_v49, 0.0 }
 0x28c   : > { %v2789_v29 = vpop.f32.mrf.mxu0 }
 0x28d   : > { %v2911_v28 = vmax.f32 %v2786_v40, 0.0  ;;  %v2962_v32 = vpack.c.bf16 %v2910_v19, %v2908_v25  ;;  %v2790_v5 = vadd.f32 %v2789_v29, %v5399_v31 }
 0x28e   : > { %v2791_v58 = vpop.f32.mrf.mxu0 }
 0x28f   : > { %v2963_v27 = vpack.c.bf16 %v2911_v28, %v2909_v13  ;;  %v2792_v38 = vadd.f32 %v2791_v58, %v5395_v17  ;;  %v2912_v8 = vmax.f32 %v2790_v5, 0.0 }
 0x290   : > { %v2793_v46 = vpop.f32.mrf.mxu0 }
 0x291   : > { %v2794_v35 = vadd.f32 %v2793_v46, %v5399_v31  ;;  %3191 = vmatprep.mubr.bf16.mxu1 %v2963_v27  ;;  %v2913_v47 = vmax.f32 %v2792_v38, 0.0 }
 0x292   : > { %v2795_v53 = vpop.f32.mrf.mxu0  ;;  %3192 = vmatmul.mubr.bf16.gmra.mxu1 %v2962_v32 }
 0x293   : > { %v2796_v45 = vadd.f32 %v2795_v53, %v5395_v17  ;;  %v2914_v34 = vmax.f32 %v2794_v35, 0.0 }
 0x294   : > { %v2799_v63 = vpop.f32.mrf.mxu0 }
 0x295   : > { %v2915_v61 = vmax.f32 %v2796_v45, 0.0  ;;  %v2964_v10 = vpack.c.bf16 %v2914_v34, %v2912_v8  ;;  %v2800_v4 = vadd.f32 %v2799_v63, %v5399_v31 }
 0x296   : > { %v2801_v23 = vpop.f32.mrf.mxu0 }
 0x297   : > { %v2965_v15 = vpack.c.bf16 %v2915_v61, %v2913_v47  ;;  %v2802_v54 = vadd.f32 %v2801_v23, %v5395_v17  ;;  %v2916_v0 = vmax.f32 %v2800_v4, 0.0 }
 0x298   : > { %v2803_v12 = vpop.f32.mrf.mxu0 }
 0x299   : > { %v2804_v50 = vadd.f32 %v2803_v12, %v5399_v31  ;;  %3199 = vmatprep.mubr.bf16.mxu1 %v2965_v15  ;;  %v2917_v22 = vmax.f32 %v2802_v54, 0.0 }
 0x29a   : > { %v2805_v33 = vpop.f32.mrf.mxu0  ;;  %3200 = vmatmul.mubr.bf16.gmra.mxu1 %v2964_v10 }
 0x29b   : > { %v2806_v52 = vadd.f32 %v2805_v33, %v5395_v17  ;;  %v2918_v56 = vmax.f32 %v2804_v50, 0.0 }
 0x29c   : > { %v2809_v59 = vpop.f32.mrf.mxu0 }
 0x29d   : > { %v2919_v3 = vmax.f32 %v2806_v52, 0.0  ;;  %v2966_v2 = vpack.c.bf16 %v2918_v56, %v2916_v0  ;;  %v2810_v41 = vadd.f32 %v2809_v59, %v5399_v31 }
 0x29e   : > { %v2811_v39 = vpop.f32.mrf.mxu0 }
 0x29f   : > { %v2967_v14 = vpack.c.bf16 %v2919_v3, %v2917_v22  ;;  %v2812_v57 = vadd.f32 %v2811_v39, %v5395_v17  ;;  %v2920_v7 = vmax.f32 %v2810_v41, 0.0 }
 0x2a0   : > { %v2813_v55 = vpop.f32.mrf.mxu0 }
 0x2a1   : > { %v2814_v11 = vadd.f32 %v2813_v55, %v5399_v31  ;;  %3207 = vmatprep.mubr.bf16.mxu1 %v2967_v14  ;;  %v2921_v6 = vmax.f32 %v2812_v57, 0.0 }
 0x2a2   : > { %v2815_v1 = vpop.f32.mrf.mxu0  ;;  %3208 = vmatmul.mubr.bf16.gmra.mxu1 %v2966_v2 }
 0x2a3   : > { %v2816_v21 = vadd.f32 %v2815_v1, %v5395_v17  ;;  %v2922_v42 = vmax.f32 %v2814_v11, 0.0 }
 0x2a4   : > { %v2819_v16 = vpop.f32.mrf.mxu0 }
 0x2a5   : > { %v2923_v9 = vmax.f32 %v2816_v21, 0.0  ;;  %v2968_v36 = vpack.c.bf16 %v2922_v42, %v2920_v7  ;;  %v2820_v37 = vadd.f32 %v2819_v16, %v5399_v31 }
 0x2a6   : > { %v2821_v60 = vpop.f32.mrf.mxu0 }
 0x2a7   : > { %v2969_v20 = vpack.c.bf16 %v2923_v9, %v2921_v6  ;;  %v2822_v18 = vadd.f32 %v2821_v60, %v5395_v17  ;;  %v2924_v51 = vmax.f32 %v2820_v37, 0.0 }
 0x2a8   : > { %v2823_v24 = vpop.f32.mrf.mxu0 }
 0x2a9   : > { %v2824_v44 = vadd.f32 %v2823_v24, %v5399_v31  ;;  %3215 = vmatprep.mubr.bf16.mxu1 %v2969_v20  ;;  %v2925_v49 = vmax.f32 %v2822_v18, 0.0 }
 0x2aa   : > { %v2825_v30 = vpop.f32.mrf.mxu0  ;;  %3216 = vmatmul.mubr.bf16.gmra.mxu1 %v2968_v36 }
 0x2ab   : > { %v2826_v62 = vadd.f32 %v2825_v30, %v5395_v17  ;;  %v2926_v48 = vmax.f32 %v2824_v44, 0.0 }
 0x2ac   : > { %v2829_v43 = vpop.f32.mrf.mxu0 }
 0x2ad   : > { %v2927_v26 = vmax.f32 %v2826_v62, 0.0  ;;  %v2970_v29 = vpack.c.bf16 %v2926_v48, %v2924_v51  ;;  %v2830_v58 = vadd.f32 %v2829_v43, %v5399_v31 }
 0x2ae   : > { %v2831_v40 = vpop.f32.mrf.mxu0 }
 0x2af   : > { %v2971_v19 = vpack.c.bf16 %v2927_v26, %v2925_v49  ;;  %v2832_v28 = vadd.f32 %v2831_v40, %v5395_v17  ;;  %v2928_v53 = vmax.f32 %v2830_v58, 0.0 }
 0x2b0   : > { %v2833_v13 = vpop.f32.mrf.mxu0 }
 0x2b1   : > { %v2834_v25 = vadd.f32 %v2833_v13, %v5399_v31  ;;  %3223 = vmatprep.mubr.bf16.mxu1 %v2971_v19  ;;  %v2929_v35 = vmax.f32 %v2832_v28, 0.0 }
 0x2b2   : > { %v2835_v27 = vpop.f32.mrf.mxu0  ;;  %3224 = vmatmul.mubr.bf16.gmra.mxu1 %v2970_v29 }
 0x2b3   : > { %v2836_v32 = vadd.f32 %v2835_v27, %v5395_v17  ;;  %v2930_v46 = vmax.f32 %v2834_v25, 0.0 }
 0x2b4   : > { %v2839_v38 = vpop.f32.mrf.mxu0 }
 0x2b5   : > { %v2931_v5 = vmax.f32 %v2836_v32, 0.0  ;;  %v2972_v63 = vpack.c.bf16 %v2930_v46, %v2928_v53  ;;  %v2840_v23 = vadd.f32 %v2839_v38, %v5399_v31 }
 0x2b6   : > { %v2841_v45 = vpop.f32.mrf.mxu0 }
 0x2b7   : > { %v2973_v34 = vpack.c.bf16 %v2931_v5, %v2929_v35  ;;  %v2842_v61 = vadd.f32 %v2841_v45, %v5395_v17  ;;  %v2932_v33 = vmax.f32 %v2840_v23, 0.0 }
 0x2b8   : > { %v2843_v47 = vpop.f32.mrf.mxu0 }
 0x2b9   : > { %v2844_v8 = vadd.f32 %v2843_v47, %v5399_v31  ;;  %3231 = vmatprep.mubr.bf16.mxu1 %v2973_v34  ;;  %v2933_v50 = vmax.f32 %v2842_v61, 0.0 }
 0x2ba   : > { %v2845_v15 = vpop.f32.mrf.mxu0  ;;  %3232 = vmatmul.mubr.bf16.gmra.mxu1 %v2972_v63 }
 0x2bb   : > { %v2846_v10 = vadd.f32 %v2845_v15, %v5395_v17  ;;  %v2934_v12 = vmax.f32 %v2844_v8, 0.0 }
 0x2bc   : > { %v2849_v54 = vpop.f32.mrf.mxu0 }
 0x2bd   : > { %v2935_v4 = vmax.f32 %v2846_v10, 0.0  ;;  %v2974_v59 = vpack.c.bf16 %v2934_v12, %v2932_v33  ;;  %v2850_v39 = vadd.f32 %v2849_v54, %v5399_v31 }
 0x2be   : > { %v2851_v52 = vpop.f32.mrf.mxu0 }
 0x2bf   : > { %v2975_v56 = vpack.c.bf16 %v2935_v4, %v2933_v50  ;;  %v2852_v3 = vadd.f32 %v2851_v52, %v5395_v17  ;;  %v2936_v1 = vmax.f32 %v2850_v39, 0.0 }
 0x2c0   : > { %v2853_v22 = vpop.f32.mrf.mxu0 }
 0x2c1   : > { %v2854_v0 = vadd.f32 %v2853_v22, %v5399_v31  ;;  %3239 = vmatprep.mubr.bf16.mxu1 %v2975_v56  ;;  %v2937_v11 = vmax.f32 %v2852_v3, 0.0 }
 0x2c2   : > { %v2855_v14 = vpop.f32.mrf.mxu0  ;;  %3240 = vmatmul.mubr.bf16.gmra.mxu1 %v2974_v59 }
 0x2c3   : > { %v2856_v2 = vadd.f32 %v2855_v14, %v5395_v17  ;;  %v2938_v55 = vmax.f32 %v2854_v0, 0.0 }
 0x2c4   : > { %v2859_v57 = vpop.f32.mrf.mxu0 }
 0x2c5   : > { %v2939_v41 = vmax.f32 %v2856_v2, 0.0  ;;  %v2976_v16 = vpack.c.bf16 %v2938_v55, %v2936_v1  ;;  %v2860_v60 = vadd.f32 %v2859_v57, %v5399_v31 }
 0x2c6   : > { %v2861_v21 = vpop.f32.mrf.mxu0 }
 0x2c7   : > { %v2977_v42 = vpack.c.bf16 %v2939_v41, %v2937_v11  ;;  %v2862_v9 = vadd.f32 %v2861_v21, %v5395_v17  ;;  %v2940_v30 = vmax.f32 %v2860_v60, 0.0 }
 0x2c8   : > { %v2863_v6 = vpop.f32.mrf.mxu0 }
 0x2c9   : > { %v2864_v7 = vadd.f32 %v2863_v6, %v5399_v31  ;;  %3247 = vmatprep.mubr.bf16.mxu1 %v2977_v42  ;;  %v2941_v44 = vmax.f32 %v2862_v9, 0.0 }
 0x2ca   : > { %v2865_v20 = vpop.f32.mrf.mxu0  ;;  %3248 = vmatmul.mubr.bf16.gmra.mxu1 %v2976_v16 }
 0x2cb   : > { %v2866_v36 = vadd.f32 %v2865_v20, %v5395_v17  ;;  %v2942_v24 = vmax.f32 %v2864_v7, 0.0 }
 0x2cc   : > { %v2869_v18 = vpop.f32.mrf.mxu0 }
 0x2cd   : > { %v2943_v37 = vmax.f32 %v2866_v36, 0.0  ;;  %v2978_v43 = vpack.c.bf16 %v2942_v24, %v2940_v30  ;;  %v2870_v40 = vadd.f32 %v2869_v18, %v5399_v31 }
 0x2ce   : > { %v2871_v62 = vpop.f32.mrf.mxu0 }
 0x2cf   : > { %v2979_v48 = vpack.c.bf16 %v2943_v37, %v2941_v44  ;;  %v2872_v26 = vadd.f32 %v2871_v62, %v5395_v17  ;;  %v2944_v27 = vmax.f32 %v2870_v40, 0.0 }
 0x2d0   : > { %v2873_v49 = vpop.f32.mrf.mxu0 }
 0x2d1   : > { %v2874_v51 = vadd.f32 %v2873_v49, %v5399_v31  ;;  %3255 = vmatprep.mubr.bf16.mxu1 %v2979_v48  ;;  %v2945_v25 = vmax.f32 %v2872_v26, 0.0 }
 0x2d2   : > { %v2875_v19 = vpop.f32.mrf.mxu0  ;;  %3256 = vmatmul.mubr.bf16.gmra.mxu1 %v2978_v43 }
 0x2d3   : > { %v2876_v29 = vadd.f32 %v2875_v19, %v5395_v17  ;;  %v2946_v13 = vmax.f32 %v2874_v51, 0.0 }
 0x2d4   : > { %v2879_v28 = vpop.f32.mrf.mxu0 }
 0x2d5   : > { %v2947_v58 = vmax.f32 %v2876_v29, 0.0  ;;  %v2980_v38 = vpack.c.bf16 %v2946_v13, %v2944_v27  ;;  %v2880_v45 = vadd.f32 %v2879_v28, %v5399_v31 }
 0x2d6   : > { %v2881_v32 = vpop.f32.mrf.mxu0 }
 0x2d7   : > { %v2981_v46 = vpack.c.bf16 %v2947_v58, %v2945_v25  ;;  %v2882_v5 = vadd.f32 %v2881_v32, %v5395_v17  ;;  %v2948_v23 = vmax.f32 %v2880_v45, 0.0 }
 0x2d8   : > { %v2883_v35 = vpop.f32.mrf.mxu0 }
 0x2d9   : > { %v2884_v53 = vadd.f32 %v2883_v35, %v5399_v31  ;;  %3263 = vmatprep.mubr.bf16.mxu1 %v2981_v46  ;;  %v2949_v61 = vmax.f32 %v2882_v5, 0.0  ;;  %v5468_v31 = vld [vmem:[%s5533_s6] ss:$0 sm:$0xff] }
 0x2da   : > { %v2885_v34 = vpop.f32.mrf.mxu0  ;;  %3264 = vmatmul.mubr.bf16.gmra.mxu1 %v2980_v38 }
 0x2db   : > { %v2886_v63 = vadd.f32 %v2885_v34, %v5395_v17  ;;  %v2950_v47 = vmax.f32 %v2884_v53, 0.0 }
 0x2dd   : > { %v2951_v8 = vmax.f32 %v2886_v63, 0.0  ;;  %v2982_v10 = vpack.c.bf16 %v2950_v47, %v2948_v23 }
 0x2df   : > { %v2983_v15 = vpack.c.bf16 %v2951_v8, %v2949_v61 }
 0x2e1   : > { %3271 = vmatprep.mubr.bf16.mxu1 %v2983_v15 }
 0x2e2   : > { %3272 = vmatmul.mubr.bf16.gmra.mxu1 %v2982_v10 }
 0x32a   : > { %v3957_v12 = vpop.f32.mrf.mxu1 }
 0x32c   : > { %v3958_v54 = vpop.f32.mrf.mxu1 }
 0x32d   : > { %v3959_v4 = vadd.f32 %v3958_v54, %v3957_v12 }
 0x32e   : > { %v3960_v50 = vpop.f32.mrf.mxu1 }
 0x32f   : > { %v3154_v56 = vadd.f32 %v3959_v4, %v5468_v31 }
 0x330   : > { %v3961_v33 = vpop.f32.mrf.mxu1 }
 0x331   : > { %v3962_v17 = vadd.f32 %v3961_v33, %v3960_v50 }
 0x332   : > { %v3963_v52 = vpop.f32.mrf.mxu1 }
 0x333   : > { %v3157_v59 = vadd.f32 %v3962_v17, %v5468_v31 }
 0x334   : > { %v3964_v22 = vpop.f32.mrf.mxu1 }
 0x335   : > { %v3849_v3 = vpack.c.bf16 %v3157_v59, %v3154_v56  ;;  %v3965_v39 = vadd.f32 %v3964_v22, %v3963_v52 }
 0x336   : > { %v3966_v0 = vpop.f32.mrf.mxu1 }
 0x337   : > { %3850 = vst [vmem:[%s5476_s23] sm:$0xff] %v3849_v3   ;;  %v3162_v57 = vadd.f32 %v3965_v39, %v5468_v31 }
 0x338   : > { %v3967_v14 = vpop.f32.mrf.mxu1 }
 0x339   : > { %v3968_v2 = vadd.f32 %v3967_v14, %v3966_v0 }
 0x33a   : > { %v3969_v55 = vpop.f32.mrf.mxu1 }
 0x33b   : > { %v3165_v11 = vadd.f32 %v3968_v2, %v5468_v31 }
 0x33c   : > { %v3970_v41 = vpop.f32.mrf.mxu1 }
 0x33d   : > { %v3854_v1 = vpack.c.bf16 %v3165_v11, %v3162_v57  ;;  %v3971_v42 = vadd.f32 %v3970_v41, %v3969_v55 }
 0x33e   : > { %v3972_v21 = vpop.f32.mrf.mxu1 }
 0x33f   : > { %3926 = vst [vmem:[%s5476_s23 + $0x8] sm:$0xff] %v3854_v1   ;;  %v3170_v7 = vadd.f32 %v3971_v42, %v5468_v31 }
 0x340   : > { %v3973_v16 = vpop.f32.mrf.mxu1 }
 0x341   : > { %v3974_v6 = vadd.f32 %v3973_v16, %v3972_v21 }
 0x342   : > { %v3975_v9 = vpop.f32.mrf.mxu1 }
 0x343   : > { %v3173_v60 = vadd.f32 %v3974_v6, %v5468_v31 }
 0x344   : > { %v3976_v20 = vpop.f32.mrf.mxu1 }
 0x345   : > { %v3859_v36 = vpack.c.bf16 %v3173_v60, %v3170_v7  ;;  %v3977_v18 = vadd.f32 %v3976_v20, %v3975_v9 }
 0x346   : > { %v3978_v24 = vpop.f32.mrf.mxu1 }
 0x347   : > { %3927 = vst [vmem:[%s5476_s23 + $0x10] sm:$0xff] %v3859_v36   ;;  %v3178_v62 = vadd.f32 %v3977_v18, %v5468_v31 }
 0x348   : > { %v3979_v44 = vpop.f32.mrf.mxu1 }
 0x349   : > { %v3980_v37 = vadd.f32 %v3979_v44, %v3978_v24 }
 0x34a   : > { %v3981_v30 = vpop.f32.mrf.mxu1 }
 0x34b   : > { %v3181_v48 = vadd.f32 %v3980_v37, %v5468_v31 }
 0x34c   : > { %v3982_v43 = vpop.f32.mrf.mxu1 }
 0x34d   : > { %v3864_v49 = vpack.c.bf16 %v3181_v48, %v3178_v62  ;;  %v3983_v51 = vadd.f32 %v3982_v43, %v3981_v30 }
 0x34e   : > { %v3984_v26 = vpop.f32.mrf.mxu1 }
 0x34f   : > { %3928 = vst [vmem:[%s5476_s23 + $0x18] sm:$0xff] %v3864_v49   ;;  %v3186_v13 = vadd.f32 %v3983_v51, %v5468_v31 }
 0x350   : > { %v3985_v40 = vpop.f32.mrf.mxu1 }
 0x351   : > { %v3986_v19 = vadd.f32 %v3985_v40, %v3984_v26 }
 0x352   : > { %v3987_v29 = vpop.f32.mrf.mxu1 }
 0x353   : > { %v3189_v28 = vadd.f32 %v3986_v19, %v5468_v31 }
 0x354   : > { %v3988_v25 = vpop.f32.mrf.mxu1 }
 0x355   : > { %v3869_v58 = vpack.c.bf16 %v3189_v28, %v3186_v13  ;;  %v3989_v32 = vadd.f32 %v3988_v25, %v3987_v29 }
 0x356   : > { %v3990_v27 = vpop.f32.mrf.mxu1 }
 0x357   : > { %3929 = vst [vmem:[%s5476_s23 + $0x20] sm:$0xff] %v3869_v58   ;;  %v3194_v5 = vadd.f32 %v3989_v32, %v5468_v31 }
 0x358   : > { %v3991_v46 = vpop.f32.mrf.mxu1 }
 0x359   : > { %v3992_v38 = vadd.f32 %v3991_v46, %v3990_v27 }
 0x35a   : > { %v3993_v35 = vpop.f32.mrf.mxu1 }
 0x35b   : > { %v3197_v53 = vadd.f32 %v3992_v38, %v5468_v31 }
 0x35c   : > { %v3994_v45 = vpop.f32.mrf.mxu1 }
 0x35d   : > { %v3874_v34 = vpack.c.bf16 %v3197_v53, %v3194_v5  ;;  %v3995_v47 = vadd.f32 %v3994_v45, %v3993_v35 }
 0x35e   : > { %v3996_v63 = vpop.f32.mrf.mxu1 }
 0x35f   : > { %3930 = vst [vmem:[%s5476_s23 + $0x28] sm:$0xff] %v3874_v34   ;;  %v3202_v15 = vadd.f32 %v3995_v47, %v5468_v31 }
 0x360   : > { %v3997_v61 = vpop.f32.mrf.mxu1 }
 0x361   : > { %v3998_v8 = vadd.f32 %v3997_v61, %v3996_v63 }
 0x362   : > { %v3999_v23 = vpop.f32.mrf.mxu1 }
 0x363   : > { %v3205_v10 = vadd.f32 %v3998_v8, %v5468_v31 }
 0x364   : > { %v4000_v12 = vpop.f32.mrf.mxu1 }
 0x365   : > { %v3879_v54 = vpack.c.bf16 %v3205_v10, %v3202_v15  ;;  %v4001_v4 = vadd.f32 %v4000_v12, %v3999_v23 }
 0x366   : > { %v4002_v50 = vpop.f32.mrf.mxu1 }
 0x367   : > { %3931 = vst [vmem:[%s5476_s23 + $0x30] sm:$0xff] %v3879_v54   ;;  %v3210_v56 = vadd.f32 %v4001_v4, %v5468_v31 }
 0x368   : > { %v4003_v33 = vpop.f32.mrf.mxu1 }
 0x369   : > { %v4004_v17 = vadd.f32 %v4003_v33, %v4002_v50 }
 0x36a   : > { %v4005_v52 = vpop.f32.mrf.mxu1 }
 0x36b   : > { %v3213_v59 = vadd.f32 %v4004_v17, %v5468_v31 }
 0x36c   : > { %v4006_v22 = vpop.f32.mrf.mxu1 }
 0x36d   : > { %v3884_v3 = vpack.c.bf16 %v3213_v59, %v3210_v56  ;;  %v4007_v39 = vadd.f32 %v4006_v22, %v4005_v52 }
 0x36e   : > { %v4008_v0 = vpop.f32.mrf.mxu1 }
 0x36f   : > { %3932 = vst [vmem:[%s5476_s23 + $0x38] sm:$0xff] %v3884_v3   ;;  %v3218_v57 = vadd.f32 %v4007_v39, %v5468_v31 }
 0x370   : > { %v4009_v14 = vpop.f32.mrf.mxu1 }
 0x371   : > { %v4010_v2 = vadd.f32 %v4009_v14, %v4008_v0 }
 0x372   : > { %v4011_v55 = vpop.f32.mrf.mxu1 }
 0x373   : > { %v3221_v11 = vadd.f32 %v4010_v2, %v5468_v31 }
 0x374   : > { %v4012_v41 = vpop.f32.mrf.mxu1 }
 0x375   : > { %v3889_v1 = vpack.c.bf16 %v3221_v11, %v3218_v57  ;;  %v4013_v42 = vadd.f32 %v4012_v41, %v4011_v55 }
 0x376   : > { %v4014_v21 = vpop.f32.mrf.mxu1 }
 0x377   : > { %3933 = vst [vmem:[%s5476_s23 + $0x40] sm:$0xff] %v3889_v1   ;;  %v3226_v7 = vadd.f32 %v4013_v42, %v5468_v31 }
 0x378   : > { %v4015_v16 = vpop.f32.mrf.mxu1 }
 0x379   : > { %v4016_v6 = vadd.f32 %v4015_v16, %v4014_v21 }
 0x37a   : > { %v4017_v9 = vpop.f32.mrf.mxu1 }
 0x37b   : > { %v3229_v60 = vadd.f32 %v4016_v6, %v5468_v31 }
 0x37c   : > { %v4018_v20 = vpop.f32.mrf.mxu1 }
 0x37d   : > { %v3894_v36 = vpack.c.bf16 %v3229_v60, %v3226_v7  ;;  %v4019_v18 = vadd.f32 %v4018_v20, %v4017_v9 }
 0x37e   : > { %v4020_v24 = vpop.f32.mrf.mxu1 }
 0x37f   : > { %3934 = vst [vmem:[%s5476_s23 + $0x48] sm:$0xff] %v3894_v36   ;;  %v3234_v62 = vadd.f32 %v4019_v18, %v5468_v31 }
 0x380   : > { %v4021_v44 = vpop.f32.mrf.mxu1 }
 0x381   : > { %v4022_v37 = vadd.f32 %v4021_v44, %v4020_v24 }
 0x382   : > { %v4023_v30 = vpop.f32.mrf.mxu1 }
 0x383   : > { %v3237_v48 = vadd.f32 %v4022_v37, %v5468_v31 }
 0x384   : > { %v4024_v43 = vpop.f32.mrf.mxu1 }
 0x385   : > { %v3899_v49 = vpack.c.bf16 %v3237_v48, %v3234_v62  ;;  %v4025_v51 = vadd.f32 %v4024_v43, %v4023_v30 }
 0x386   : > { %v4026_v26 = vpop.f32.mrf.mxu1 }
 0x387   : > { %3935 = vst [vmem:[%s5476_s23 + $0x50] sm:$0xff] %v3899_v49   ;;  %v3242_v13 = vadd.f32 %v4025_v51, %v5468_v31 }
 0x388   : > { %v4027_v40 = vpop.f32.mrf.mxu1 }
 0x389   : > { %v4028_v19 = vadd.f32 %v4027_v40, %v4026_v26 }
 0x38a   : > { %v4029_v29 = vpop.f32.mrf.mxu1 }
 0x38b   : > { %v3245_v28 = vadd.f32 %v4028_v19, %v5468_v31 }
 0x38c   : > { %v4030_v25 = vpop.f32.mrf.mxu1 }
 0x38d   : > { %v3904_v58 = vpack.c.bf16 %v3245_v28, %v3242_v13  ;;  %v4031_v32 = vadd.f32 %v4030_v25, %v4029_v29 }
 0x38e   : > { %v4032_v27 = vpop.f32.mrf.mxu1 }
 0x38f   : > { %3936 = vst [vmem:[%s5476_s23 + $0x58] sm:$0xff] %v3904_v58   ;;  %v3250_v5 = vadd.f32 %v4031_v32, %v5468_v31 }
 0x390   : > { %v4033_v46 = vpop.f32.mrf.mxu1 }
 0x391   : > { %v4034_v38 = vadd.f32 %v4033_v46, %v4032_v27 }
 0x392   : > { %v4035_v35 = vpop.f32.mrf.mxu1 }
 0x393   : > { %v3253_v53 = vadd.f32 %v4034_v38, %v5468_v31 }
 0x394   : > { %v4036_v45 = vpop.f32.mrf.mxu1 }
 0x395   : > { %v3909_v34 = vpack.c.bf16 %v3253_v53, %v3250_v5  ;;  %v4037_v47 = vadd.f32 %v4036_v45, %v4035_v35 }
 0x396   : > { %v4038_v63 = vpop.f32.mrf.mxu1 }
 0x397   : > { %3937 = vst [vmem:[%s5476_s23 + $0x60] sm:$0xff] %v3909_v34   ;;  %v3258_v15 = vadd.f32 %v4037_v47, %v5468_v31 }
 0x398   : > { %v4039_v61 = vpop.f32.mrf.mxu1 }
 0x399   : > { %v4040_v8 = vadd.f32 %v4039_v61, %v4038_v63 }
 0x39a   : > { %v4041_v23 = vpop.f32.mrf.mxu1 }
 0x39b   : > { %v3261_v10 = vadd.f32 %v4040_v8, %v5468_v31 }
 0x39c   : > { %v4042_v12 = vpop.f32.mrf.mxu1 }
 0x39d   : > { %v3914_v54 = vpack.c.bf16 %v3261_v10, %v3258_v15  ;;  %v4043_v4 = vadd.f32 %v4042_v12, %v4041_v23 }
 0x39e   : > { %v4044_v50 = vpop.f32.mrf.mxu1 }
 0x39f   : > { %3938 = vst [vmem:[%s5476_s23 + $0x68] sm:$0xff] %v3914_v54   ;;  %v3266_v56 = vadd.f32 %v4043_v4, %v5468_v31 }
 0x3a0   : > { %v4045_v33 = vpop.f32.mrf.mxu1 }
 0x3a1   : > { %v4046_v17 = vadd.f32 %v4045_v33, %v4044_v50 }
 0x3a2   : > { %v4047_v52 = vpop.f32.mrf.mxu1 }
 0x3a3   : > { %v3269_v59 = vadd.f32 %v4046_v17, %v5468_v31 }
 0x3a4   : > { %v4048_v22 = vpop.f32.mrf.mxu1 }
 0x3a5   : > { %v3919_v3 = vpack.c.bf16 %v3269_v59, %v3266_v56  ;;  %v4049_v39 = vadd.f32 %v4048_v22, %v4047_v52 }
 0x3a6   : > { %v4050_v0 = vpop.f32.mrf.mxu1 }
 0x3a7   : > { %3939 = vst [vmem:[%s5476_s23 + $0x70] sm:$0xff] %v3919_v3   ;;  %v3274_v55 = vadd.f32 %v4049_v39, %v5468_v31 }
 0x3a8   : > { %v4051_v14 = vpop.f32.mrf.mxu1 }
 0x3a9   : > { %v4052_v2 = vadd.f32 %v4051_v14, %v4050_v0 }
 0x3ab   : > { %v3277_v57 = vadd.f32 %v4052_v2, %v5468_v31 }
 0x3ad   : > { %v3924_v11 = vpack.c.bf16 %v3277_v57, %v3274_v55 }
 0x3af   : > { %3940 = vst [vmem:[%s5476_s23 + $0x78] sm:$0xff] %v3924_v11  }
 0x3b0 PF: > { %s17_s24 = sadd.s32 1, %s4440_s24  }
 0x3b1   : > { %p14_p4 = scmp.ge.s32.totalorder %s17_s24, 4  }
 0x3b3   :  { %16 = sbr.rel (!%p14_p4) target bundleno = 1 (0x1), region = 78 }

</bundles_post_ra>
